<compile_context>
chip_gen: v7x
topology: tpu7x:2x2x1
jax: 0.10.0
libtpu: 0.0.40
codegen_flags: <defaults>
</compile_context>

<pallas_src>
import functools

import jax
import jax.numpy as jnp
from jax.experimental import pallas as pl
from jax.experimental.pallas import tpu as pltpu

IMAGE_EMBEDDING = 72      # CFG.image_embedding
PROJECTION_DIM = 256      # CFG.projection_dim
LN_EPS = 1e-5             # nn.LayerNorm default eps
SPLIT_DEPTH = 73          # hemispheric split index along the depth axis


def _round_up(x, m):
    return ((x + m - 1) // m) * m


def _clip_fused_kernel(imL_ref, imR_ref, wenc_ref, wp_ref, wf_ref, pk_ref,
                       logit_ref):
    """Fused |imL-imR| -> encoder matmul -> ProjectionHead -> logit (one row tile)."""
    f32 = jnp.float32
    bf16 = jnp.bfloat16

    # ---- hemispheric abs-difference ("symmetry" features) ------------------
    imL = imL_ref[...].astype(f32)                       # [tb, 4672]
    imR = imR_ref[...].astype(f32)                       # [tb, 4672]
    sym = jnp.abs(imL - imR)                              # [tb, 4672] f32

    # ---- stand-in encoder: sym @ w_enc  (bf16 MXU operands, f32 accum) -----
    feats = jnp.dot(sym.astype(bf16), wenc_ref[...],
                    preferred_element_type=f32)           # [tb, 72] f32

    # ---- packed per-channel params (one VMEM tile instead of six DMAs) -----
    pk = pk_ref[...]                                      # [8, 256] f32
    b_proj = pk[0:1, :]
    b_fc   = pk[1:2, :]
    gamma  = pk[2:3, :]
    beta   = pk[3:4, :]
    w1t    = pk[4:5, :]                                   # w_fc1^T, [1, 256]
    b1     = pk[5:6, 0:1]                                 # b_fc1,   [1, 1]

    # projected = self.projection(x)   (f32 weights, f32 accum)
    projected = jnp.dot(feats, wp_ref[...],
                        preferred_element_type=f32) + b_proj       # [tb, 256]

    # x = self.gelu(projected)  -- exact erf GELU (nn.GELU default), f32
    inv_sqrt2 = f32(0.7071067811865476)
    h = 0.5 * projected * (1.0 + jax.lax.erf(projected * inv_sqrt2))

    # x = self.fc(x)            (f32 weights, f32 accum)
    h = jnp.dot(h, wf_ref[...], preferred_element_type=f32) + b_fc

    # x = self.dropout(x) -> identity at inference;  x = x + projected
    y = h + projected

    # x = self.layer_norm(x)  (biased variance, eps=1e-5), f32
    mean = jnp.mean(y, axis=-1, keepdims=True)
    var = jnp.mean((y - mean) * (y - mean), axis=-1, keepdims=True)
    y_ln = (y - mean) * jax.lax.rsqrt(var + f32(LN_EPS))
    y_ln = y_ln * gamma + beta

    # z = self.fc1(flatten(x, 1)) : 256 -> 1 as VPU mul + cross-lane reduce
    logit_ref[...] = jnp.sum(y_ln * w1t, axis=-1, keepdims=True) + b1


def clip_model_forward(image, params, *, block_b=None):
    """CLIPModel.forward: image [B, C, D, H, W] -> image_logit [B, 1]."""
    B, C, D, H, W = image.shape
    assert C == 1 and D == 2 * SPLIT_DEPTH, "hemispheric split assumes C=1, D=146"
    half_flat = C * SPLIT_DEPTH * H * W

    # Hemispheric split on the host (cheap contiguous slice + reshape, no
    # relayout/transpose); stream as bf16 to halve the per-sample DMA.
    imL = image[:, :, :SPLIT_DEPTH].reshape(B, half_flat).astype(jnp.bfloat16)
    imR = image[:, :, SPLIT_DEPTH:].reshape(B, half_flat).astype(jnp.bfloat16)

    # Row tile: 256 matches the v6e/v7x MXU height (128 also fine for v5e);
    # tiny batches collapse to a single padded tile.
    if block_b is None:
        block_b = min(256, _round_up(B, 8))
    padded_B = _round_up(B, block_b)
    if padded_B != B:
        pad = padded_B - B
        imL = jnp.pad(imL, ((0, pad), (0, 0)))
        imR = jnp.pad(imR, ((0, pad), (0, 0)))

    const2 = lambda i: (0, 0)           # weights: same block every grid step
    row_map = lambda i: (i, 0)

    out = pl.pallas_call(
        _clip_fused_kernel,
        out_shape=jax.ShapeDtypeStruct((padded_B, 1), jnp.float32),
        grid_spec=pltpu.PrefetchScalarGridSpec(
            num_scalar_prefetch=0,
            grid=(padded_B // block_b,),
            in_specs=[
                pl.BlockSpec((block_b, half_flat), row_map),               # imL
                pl.BlockSpec((block_b, half_flat), row_map),               # imR
                pl.BlockSpec((half_flat, IMAGE_EMBEDDING), const2),        # w_enc
                pl.BlockSpec((IMAGE_EMBEDDING, PROJECTION_DIM), const2),   # w_proj
                pl.BlockSpec((PROJECTION_DIM, PROJECTION_DIM), const2),    # w_fc
                pl.BlockSpec((8, PROJECTION_DIM), const2),                 # packed
            ],
            out_specs=pl.BlockSpec((block_b, 1), row_map),
        ),
        compiler_params=pltpu.CompilerParams(
            dimension_semantics=("parallel",)),
    )(imL, imR, params["w_enc"], params["w_proj"], params["w_fc"],
      params["packed"])
    return out[:B]


def _reference_forward(image, f32p):
    """Pure-JAX reference: bf16 image/w_enc for the MXU, everything else f32."""
    B = image.shape[0]
    bf16 = jnp.bfloat16
    f32 = jnp.float32
    imL = image[:, :, :SPLIT_DEPTH].reshape(B, -1).astype(bf16).astype(f32)
    imR = image[:, :, SPLIT_DEPTH:].reshape(B, -1).astype(bf16).astype(f32)
    sym = jnp.abs(imL - imR)
    feats = jnp.dot(sym.astype(bf16), f32p["w_enc"].astype(bf16),
                    preferred_element_type=f32)
    projected = jnp.dot(feats, f32p["w_proj"],
                        preferred_element_type=f32) + f32p["b_proj"]
    h = 0.5 * projected * (1.0 + jax.lax.erf(projected * 0.7071067811865476))
    h = jnp.dot(h, f32p["w_fc"], preferred_element_type=f32) + f32p["b_fc"]
    y = h + projected
    mean = jnp.mean(y, axis=-1, keepdims=True)
    var = jnp.mean((y - mean) ** 2, axis=-1, keepdims=True)
    y_ln = (y - mean) / jnp.sqrt(var + LN_EPS)
    y_ln = y_ln * f32p["ln_gamma"] + f32p["ln_beta"]
    return y_ln @ f32p["w_fc1"] + f32p["b_fc1"]


def init_params(key, enc_in_dim):
    ks = jax.random.split(key, 7)
    scale_p = 1.0 / jnp.sqrt(jnp.float32(IMAGE_EMBEDDING))
    scale_f = 1.0 / jnp.sqrt(jnp.float32(PROJECTION_DIM))

    w_enc = 0.01 * jax.random.normal(ks[0], (enc_in_dim, IMAGE_EMBEDDING), jnp.float32)
    w_proj = scale_p * jax.random.normal(ks[1], (IMAGE_EMBEDDING, PROJECTION_DIM), jnp.float32)
    b_proj = scale_p * jax.random.normal(ks[2], (PROJECTION_DIM,), jnp.float32)
    w_fc = scale_f * jax.random.normal(ks[3], (PROJECTION_DIM, PROJECTION_DIM), jnp.float32)
    b_fc = scale_f * jax.random.normal(ks[4], (PROJECTION_DIM,), jnp.float32)
    ln_gamma = jnp.ones((PROJECTION_DIM,), jnp.float32)
    ln_beta = jnp.zeros((PROJECTION_DIM,), jnp.float32)
    w_fc1 = scale_f * jax.random.normal(ks[5], (PROJECTION_DIM, 1), jnp.float32)
    b_fc1 = scale_f * jax.random.normal(ks[6], (1,), jnp.float32)

    # All per-channel vectors packed into one (8, 256) f32 VMEM tile:
    #   row 0: b_proj   row 1: b_fc   row 2: ln_gamma   row 3: ln_beta
    #   row 4: w_fc1^T  row 5: b_fc1 (broadcast)        rows 6-7: padding
    packed = jnp.zeros((8, PROJECTION_DIM), jnp.float32)
    packed = packed.at[0].set(b_proj)
    packed = packed.at[1].set(b_fc)
    packed = packed.at[2].set(ln_gamma)
    packed = packed.at[3].set(ln_beta)
    packed = packed.at[4].set(w_fc1[:, 0])
    packed = packed.at[5].set(jnp.full((PROJECTION_DIM,), b_fc1[0]))

    return {
        # only the dominant weight (w_enc) is bf16; the tiny head weights stay f32
        "w_enc": w_enc.astype(jnp.bfloat16),
        "w_proj": w_proj,
        "w_fc": w_fc,
        "packed": packed,
        # f32 originals for the pure-JAX reference check
        "f32": {
            "w_enc": w_enc, "w_proj": w_proj, "b_proj": b_proj,
            "w_fc": w_fc, "b_fc": b_fc, "ln_gamma": ln_gamma,
            "ln_beta": ln_beta, "w_fc1": w_fc1, "b_fc1": b_fc1,
        },
    }


if __name__ == "__main__":
    key = jax.random.PRNGKey(0)
    k_img, k_img2, k_params = jax.random.split(key, 3)

    # Small-but-faithful shapes: depth must be 2*73 for the hemispheric split.
    B, C, D, H, W = 2, 1, 146, 8, 8
    image = jax.random.normal(k_img, (B, C, D, H, W), jnp.float32)

    enc_in_dim = C * SPLIT_DEPTH * H * W
    params = init_params(k_params, enc_in_dim)

    # 1) tiny batch (B=2): single padded row-tile.
    fwd = jax.jit(functools.partial(clip_model_forward, params=params))
    image_logit = jax.block_until_ready(fwd(image))
    assert image_logit.shape == (B, 1)
    ref = _reference_forward(image, params["f32"])
    assert jnp.allclose(image_logit, ref, atol=2e-3, rtol=2e-3), (
        float(jnp.max(jnp.abs(image_logit - ref))))

    # 2) batched path: multi-step 1-D "parallel" grid with VMEM-resident
    #    weights (small row tile here to keep the demo/compile cheap).
    B2 = 20
    image2 = jax.random.normal(k_img2, (B2, C, D, H, W), jnp.float32)
    fwd2 = jax.jit(functools.partial(clip_model_forward, params=params, block_b=8))
    logit2 = jax.block_until_ready(fwd2(image2))
    assert logit2.shape == (B2, 1)
    ref2 = _reference_forward(image2, params["f32"])
    assert jnp.allclose(logit2, ref2, atol=2e-3, rtol=2e-3), (
        float(jnp.max(jnp.abs(logit2 - ref2))))

    print("KERNEL_OK")
</pallas_src>

<mosaic_0001>
module attributes {stable_mosaic.version = 11 : i64} {
  func.func @_clip_fused_kernel(%arg0: i32, %arg1: memref<8x4672xbf16, #tpu.memory_space<vmem>>, %arg2: memref<8x4672xbf16, #tpu.memory_space<vmem>>, %arg3: memref<4672x72xbf16, #tpu.memory_space<vmem>>, %arg4: memref<72x256xf32, #tpu.memory_space<vmem>>, %arg5: memref<256x256xf32, #tpu.memory_space<vmem>>, %arg6: memref<8x256xf32, #tpu.memory_space<vmem>>, %arg7: memref<8x1xf32, #tpu.memory_space<vmem>>) attributes {dimension_semantics = [#tpu.dimension_semantics<parallel>], iteration_bounds = array<i64: 1>, scalar_prefetch = 0 : i64, scratch_operands = 0 : i64, tpu.core_type = #tpu.core_type<tc>, window_params = [{transform_indices = @transform_0, window_bounds = array<i64: 8, 4672>}, {transform_indices = @transform_1, window_bounds = array<i64: 8, 4672>}, {pipeline_mode = #tpu.pipeline_mode<synchronous>, transform_indices = @transform_2, window_bounds = array<i64: 4672, 72>}, {pipeline_mode = #tpu.pipeline_mode<synchronous>, transform_indices = @transform_3, window_bounds = array<i64: 72, 256>}, {pipeline_mode = #tpu.pipeline_mode<synchronous>, transform_indices = @transform_4, window_bounds = array<i64: 256, 256>}, {pipeline_mode = #tpu.pipeline_mode<synchronous>, transform_indices = @transform_5, window_bounds = array<i64: 8, 256>}, {transform_indices = @transform_6, window_bounds = array<i64: 8, 1>}]} {
    %c0 = arith.constant 0 : index
    %c0_0 = arith.constant 0 : index
    %0 = vector.load %arg1[%c0, %c0_0] : memref<8x4672xbf16, #tpu.memory_space<vmem>>, vector<8x4672xbf16>
    %1 = arith.extf %0 : vector<8x4672xbf16> to vector<8x4672xf32>
    %c0_1 = arith.constant 0 : index
    %c0_2 = arith.constant 0 : index
    %2 = vector.load %arg2[%c0_1, %c0_2] : memref<8x4672xbf16, #tpu.memory_space<vmem>>, vector<8x4672xbf16>
    %3 = arith.extf %2 : vector<8x4672xbf16> to vector<8x4672xf32>
    %4 = arith.subf %1, %3 : vector<8x4672xf32>
    %5 = math.absf %4 : vector<8x4672xf32>
    %6 = arith.truncf %5 : vector<8x4672xf32> to vector<8x4672xbf16>
    %c0_3 = arith.constant 0 : index
    %c0_4 = arith.constant 0 : index
    %7 = vector.load %arg3[%c0_3, %c0_4] : memref<4672x72xbf16, #tpu.memory_space<vmem>>, vector<4672x72xbf16>
    %cst = arith.constant dense<0.000000e+00> : vector<8x72xf32>
    %8 = tpu.matmul %6, %7, %cst {dimension_numbers = #tpu.dot_dimension_numbers<[1], [0], [0], [1], [0, 0, 1, 1], [], []>} : vector<8x4672xbf16>, vector<4672x72xbf16>, vector<8x72xf32> -> vector<8x72xf32>
    %c0_5 = arith.constant 0 : index
    %c0_6 = arith.constant 0 : index
    %9 = vector.load %arg6[%c0_5, %c0_6] : memref<8x256xf32, #tpu.memory_space<vmem>>, vector<8x256xf32>
    %10 = vector.extract_strided_slice %9 {offsets = [0, 0], sizes = [1, 256], strides = [1, 1]} : vector<8x256xf32> to vector<1x256xf32>
    %11 = vector.extract_strided_slice %9 {offsets = [1, 0], sizes = [1, 256], strides = [1, 1]} : vector<8x256xf32> to vector<1x256xf32>
    %12 = vector.extract_strided_slice %9 {offsets = [2, 0], sizes = [1, 256], strides = [1, 1]} : vector<8x256xf32> to vector<1x256xf32>
    %13 = vector.extract_strided_slice %9 {offsets = [3, 0], sizes = [1, 256], strides = [1, 1]} : vector<8x256xf32> to vector<1x256xf32>
    %14 = vector.extract_strided_slice %9 {offsets = [4, 0], sizes = [1, 256], strides = [1, 1]} : vector<8x256xf32> to vector<1x256xf32>
    %15 = vector.extract_strided_slice %9 {offsets = [5, 0], sizes = [1, 1], strides = [1, 1]} : vector<8x256xf32> to vector<1x1xf32>
    %c0_7 = arith.constant 0 : index
    %c0_8 = arith.constant 0 : index
    %16 = vector.load %arg4[%c0_7, %c0_8] : memref<72x256xf32, #tpu.memory_space<vmem>>, vector<72x256xf32>
    %cst_9 = arith.constant dense<0.000000e+00> : vector<8x256xf32>
    %17 = tpu.matmul %8, %16, %cst_9 {dimension_numbers = #tpu.dot_dimension_numbers<[1], [0], [0], [1], [0, 0, 1, 1], [], []>} : vector<8x72xf32>, vector<72x256xf32>, vector<8x256xf32> -> vector<8x256xf32>
    %18 = vector.broadcast %10 : vector<1x256xf32> to vector<8x256xf32>
    %19 = arith.addf %17, %18 : vector<8x256xf32>
    %cst_10 = arith.constant 5.000000e-01 : f32
    %20 = vector.broadcast %cst_10 : f32 to vector<8x256xf32>
    %21 = arith.mulf %20, %19 : vector<8x256xf32>
    %cst_11 = arith.constant 0.707106769 : f32
    %22 = vector.broadcast %cst_11 : f32 to vector<8x256xf32>
    %23 = arith.mulf %19, %22 : vector<8x256xf32>
    %24 = math.erf %23 : vector<8x256xf32>
    %cst_12 = arith.constant 1.000000e+00 : f32
    %25 = vector.broadcast %cst_12 : f32 to vector<8x256xf32>
    %26 = arith.addf %25, %24 : vector<8x256xf32>
    %27 = arith.mulf %21, %26 : vector<8x256xf32>
    %c0_13 = arith.constant 0 : index
    %c0_14 = arith.constant 0 : index
    %28 = vector.load %arg5[%c0_13, %c0_14] : memref<256x256xf32, #tpu.memory_space<vmem>>, vector<256x256xf32>
    %cst_15 = arith.constant dense<0.000000e+00> : vector<8x256xf32>
    %29 = tpu.matmul %27, %28, %cst_15 {dimension_numbers = #tpu.dot_dimension_numbers<[1], [0], [0], [1], [0, 0, 1, 1], [], []>} : vector<8x256xf32>, vector<256x256xf32>, vector<8x256xf32> -> vector<8x256xf32>
    %30 = vector.broadcast %11 : vector<1x256xf32> to vector<8x256xf32>
    %31 = arith.addf %29, %30 : vector<8x256xf32>
    %32 = arith.addf %31, %19 : vector<8x256xf32>
    %cst_16 = arith.constant dense<0.000000e+00> : vector<8xf32>
    %33 = vector.multi_reduction <add>, %32, %cst_16 [1] : vector<8x256xf32> to vector<8xf32>
    %34 = vector.shape_cast %33 : vector<8xf32> to vector<8x1xf32>
    %cst_17 = arith.constant 2.560000e+02 : f32
    %35 = vector.broadcast %cst_17 : f32 to vector<8x1xf32>
    %36 = arith.divf %34, %35 : vector<8x1xf32>
    %37 = vector.broadcast %36 : vector<8x1xf32> to vector<8x256xf32>
    %38 = arith.subf %32, %37 : vector<8x256xf32>
    %39 = vector.broadcast %36 : vector<8x1xf32> to vector<8x256xf32>
    %40 = arith.subf %32, %39 : vector<8x256xf32>
    %41 = arith.mulf %38, %40 : vector<8x256xf32>
    %cst_18 = arith.constant dense<0.000000e+00> : vector<8xf32>
    %42 = vector.multi_reduction <add>, %41, %cst_18 [1] : vector<8x256xf32> to vector<8xf32>
    %43 = vector.shape_cast %42 : vector<8xf32> to vector<8x1xf32>
    %cst_19 = arith.constant 2.560000e+02 : f32
    %44 = vector.broadcast %cst_19 : f32 to vector<8x1xf32>
    %45 = arith.divf %43, %44 : vector<8x1xf32>
    %46 = vector.broadcast %36 : vector<8x1xf32> to vector<8x256xf32>
    %47 = arith.subf %32, %46 : vector<8x256xf32>
    %cst_20 = arith.constant 9.99999974E-6 : f32
    %48 = vector.broadcast %cst_20 : f32 to vector<8x1xf32>
    %49 = arith.addf %45, %48 : vector<8x1xf32>
    %50 = math.rsqrt %49 : vector<8x1xf32>
    %51 = vector.broadcast %50 : vector<8x1xf32> to vector<8x256xf32>
    %52 = arith.mulf %47, %51 : vector<8x256xf32>
    %53 = vector.broadcast %12 : vector<1x256xf32> to vector<8x256xf32>
    %54 = arith.mulf %52, %53 : vector<8x256xf32>
    %55 = vector.broadcast %13 : vector<1x256xf32> to vector<8x256xf32>
    %56 = arith.addf %54, %55 : vector<8x256xf32>
    %57 = vector.broadcast %14 : vector<1x256xf32> to vector<8x256xf32>
    %58 = arith.mulf %56, %57 : vector<8x256xf32>
    %cst_21 = arith.constant dense<0.000000e+00> : vector<8xf32>
    %59 = vector.multi_reduction <add>, %58, %cst_21 [1] : vector<8x256xf32> to vector<8xf32>
    %60 = vector.shape_cast %59 : vector<8xf32> to vector<8x1xf32>
    %61 = vector.broadcast %15 : vector<1x1xf32> to vector<8x1xf32>
    %62 = arith.addf %60, %61 : vector<8x1xf32>
    %c0_22 = arith.constant 0 : index
    %c0_23 = arith.constant 0 : index
    %63 = vector.load %arg7[%c0_22, %c0_23] : memref<8x1xf32, #tpu.memory_space<vmem>>, vector<8x1xf32>
    tpu.vector_store %arg7[%c0_22, %c0_23], %62 {strides = array<i32>} : memref<8x1xf32, #tpu.memory_space<vmem>>, vector<8x1xf32>,
    return
  }
  func.func @transform_0(%arg0: i32) -> (i32, i32) {
    %c0_i32 = arith.constant 0 : i32
    %c0_i32_0 = arith.constant 0 : i32
    return %arg0, %c0_i32 : i32, i32
  }
  func.func @transform_1(%arg0: i32) -> (i32, i32) {
    %c0_i32 = arith.constant 0 : i32
    %c0_i32_0 = arith.constant 0 : i32
    return %arg0, %c0_i32 : i32, i32
  }
  func.func @transform_2(%arg0: i32) -> (i32, i32) {
    %c0_i32 = arith.constant 0 : i32
    %c0_i32_0 = arith.constant 0 : i32
    %c0_i32_1 = arith.constant 0 : i32
    return %c0_i32, %c0_i32_0 : i32, i32
  }
  func.func @transform_3(%arg0: i32) -> (i32, i32) {
    %c0_i32 = arith.constant 0 : i32
    %c0_i32_0 = arith.constant 0 : i32
    %c0_i32_1 = arith.constant 0 : i32
    return %c0_i32, %c0_i32_0 : i32, i32
  }
  func.func @transform_4(%arg0: i32) -> (i32, i32) {
    %c0_i32 = arith.constant 0 : i32
    %c0_i32_0 = arith.constant 0 : i32
    %c0_i32_1 = arith.constant 0 : i32
    return %c0_i32, %c0_i32_0 : i32, i32
  }
  func.func @transform_5(%arg0: i32) -> (i32, i32) {
    %c0_i32 = arith.constant 0 : i32
    %c0_i32_0 = arith.constant 0 : i32
    %c0_i32_1 = arith.constant 0 : i32
    return %c0_i32, %c0_i32_0 : i32, i32
  }
  func.func @transform_6(%arg0: i32) -> (i32, i32) {
    %c0_i32 = arith.constant 0 : i32
    %c0_i32_0 = arith.constant 0 : i32
    return %arg0, %c0_i32 : i32, i32
  }
}

</mosaic_0001>

<bundles_post_ra>
// kernel: clip_model_forward.1
= control target key start
LH: loop header
LB: loop body
LE: loop exit
PB: predicated region body
PF: predicated region fallthrough
CT: control target
= control target key end

     0   :  { %vm4754_vm0 = vmmov 0   ;;  %vm2583_vm1 = vcmask 523264   ;;  %vm3375_vm2 = vcmask 588800   ;;  %vm3660_vm3 = vcmask 7168   ;;  %s6066_s2 = inlined_call_operand.vmem [shape: bf16[4672,72], index: 2, kind: input, shape index: {}]   ;;  %s6067_s0 = inlined_call_operand.vmem [shape: bf16[8,4672], index: 0, kind: input, shape index: {}]   ;;  %s6068_s1 = inlined_call_operand.vmem [shape: bf16[8,4672], index: 1, kind: input, shape index: {}]   ;;  %s6069_s3 = inlined_call_operand.vmem [shape: f32[72,256], index: 3, kind: input, shape index: {}]   ;;  %s6070_s4 = inlined_call_operand.vmem [shape: f32[256,256], index: 4, kind: input, shape index: {}]   ;;  %s6071_s5 = inlined_call_operand.vmem [shape: f32[8,256], index: 5, kind: input, shape index: {}]   ;;  %s6072_s6 = inlined_call_operand.vmem [shape: f32[8,1], index: 6, kind: output, shape index: {}]  }
   0x1   :  { %v4455_v0 = vld [vmem:[%s6066_s2 + $0x40] sm:$0xff]   ;;  %v4457_v2 = vld [vmem:[%s6066_s2 + $0x48] sm:$0xff]   ;;  %v4459_v4 = vld [vmem:[%s6066_s2 + $0x50] sm:$0xff]  }
   0x2   :  { %v4456_v1 = vld [vmem:[%s6066_s2] sm:$0xff]   ;;  %3960 = vmatprep.subr.bf16.mxu1 %v4455_v0  ;;  %v4458_v3 = vld [vmem:[%s6066_s2 + $0x8] sm:$0xff]   ;;  %v4460_v5 = vld [vmem:[%s6066_s2 + $0x10] sm:$0xff]  }
   0x3   :  { %3961 = vmatpush3.bf16.msra.mxu1 %v4456_v1  ;;  %v4461_v6 = vld [vmem:[%s6066_s2 + $0x58] sm:$0xff]   ;;  %v4463_v8 = vld [vmem:[%s6066_s2 + $0x60] sm:$0xff]   ;;  %v4465_v10 = vld [vmem:[%s6066_s2 + $0x68] sm:$0xff]  }
   0x4   :  { %3962 = vmatprep.subr.bf16.mxu1 %v4457_v2  ;;  %v4462_v7 = vld [vmem:[%s6066_s2 + $0x18] sm:$0xff]   ;;  %v4464_v9 = vld [vmem:[%s6066_s2 + $0x20] sm:$0xff]   ;;  %v4466_v13 = vld [vmem:[%s6066_s2 + $0x28] sm:$0xff]  }
   0x5   :  { %v24_v11 = vld [vmem:[%s6067_s0] sm:$0xff]  ;;  %v4467_v16 = vld [vmem:[%s6066_s2 + $0x70] sm:$0xff]   ;;  %v4469_v25 = vld [vmem:[%s6066_s2 + $0x78] sm:$0xff]  }
   0x6   :  { %v80_v12 = vld [vmem:[%s6068_s1] sm:$0xff]  ;;  %v44_v14 = vunpack.c.h.bf16 %v24_v11  ;;  %v43_v17 = vunpack.c.l.bf16 %v24_v11  ;;  %v4468_v23 = vld [vmem:[%s6066_s2 + $0x30] sm:$0xff]   ;;  %v4477_v27 = vld [vmem:[%s6066_s2 + $0x148] sm:$0xff]  }
   0x7   :  { %3963 = vmatpush3.bf16.msra.mxu1 %v4458_v3  ;;  %v100_v15 = vunpack.c.h.bf16 %v80_v12  ;;  %v99_v18 = vunpack.c.l.bf16 %v80_v12  ;;  %v4473_v20 = vld [vmem:[%s6066_s2 + $0x140] sm:$0xff]   ;;  %v4470_v28 = vld [vmem:[%s6066_s2 + $0x38] sm:$0xff]   ;;  %v4478_v29 = vld [vmem:[%s6066_s2 + $0x108] sm:$0xff]  }
   0x8   :  { %3964 = vmatprep.subr.bf16.mxu1 %v4459_v4  ;;  %v4474_v21 = vld [vmem:[%s6066_s2 + $0x100] sm:$0xff]   ;;  %4004 = vmatprep.subr.bf16.mxu0 %v4473_v20  ;;  %v4481_v32 = vld [vmem:[%s6066_s2 + $0x150] sm:$0xff]   ;;  %v4475_v36 = vld [vmem:[%s6066_s2 + $0xc8] sm:$0xff]  }
   0x9   :  { %v137_v19 = vsub.f32 %v44_v14, %v100_v15  ;;  %v136_v24 = vsub.f32 %v43_v17, %v99_v18  ;;  %4005 = vmatpush3.bf16.msra.mxu0 %v4474_v21  ;;  %v4471_v31 = vld [vmem:[%s6066_s2 + $0xc0] sm:$0xff]   ;;  %v4482_v33 = vld [vmem:[%s6066_s2 + $0x110] sm:$0xff]   ;;  %v4485_v37 = vld [vmem:[%s6066_s2 + $0x158] sm:$0xff]  }
   0xa   :  { %4006 = vmatprep.subr.bf16.mxu0 %v4477_v27  ;;  %v4472_v35 = vld [vmem:[%s6066_s2 + $0x80] sm:$0xff]   ;;  %v4486_v38 = vld [vmem:[%s6066_s2 + $0x118] sm:$0xff]   ;;  %v4476_v39 = vld [vmem:[%s6066_s2 + $0x88] sm:$0xff]  }
   0xb   :  { %3965 = vmatpush3.bf16.msra.mxu1 %v4460_v5  ;;  %v174_v22 = vand.u32 2147483647, %v137_v19  ;;  %v173_v30 = vand.u32 2147483647, %v136_v24  ;;  %v4479_v40 = vld [vmem:[%s6066_s2 + $0xd0] sm:$0xff]   ;;  %v4489_v41 = vld [vmem:[%s6066_s2 + $0x160] sm:$0xff]  }
   0xc   :  { %3966 = vmatprep.subr.bf16.mxu1 %v4461_v6  ;;  %v4490_v42 = vld [vmem:[%s6066_s2 + $0x120] sm:$0xff]   ;;  %v4480_v43 = vld [vmem:[%s6066_s2 + $0x90] sm:$0xff]   ;;  %v4483_v44 = vld [vmem:[%s6066_s2 + $0xd8] sm:$0xff]  }
   0xd   :  { %v211_v26 = vpack.c.bf16 %v174_v22, %v174_v22  ;;  %4007 = vmatpush3.bf16.msra.mxu0 %v4478_v29  ;;  %v210_v34 = vpack.c.bf16 %v173_v30, %v173_v30  ;;  %v4493_v45 = vld [vmem:[%s6066_s2 + $0x168] sm:$0xff]   ;;  %v4484_v47 = vld [vmem:[%s6066_s2 + $0x98] sm:$0xff]   ;;  %v4487_v48 = vld [vmem:[%s6066_s2 + $0xe0] sm:$0xff]  }
   0xe   :  { %4008 = vmatprep.subr.bf16.mxu0 %v4481_v32  ;;  %v4494_v46 = vld [vmem:[%s6066_s2 + $0x128] sm:$0xff]   ;;  %v4497_v49 = vld [vmem:[%s6066_s2 + $0x170] sm:$0xff]   ;;  %v4488_v51 = vld [vmem:[%s6066_s2 + $0xa0] sm:$0xff]  }
   0xf   :  { %3967 = vmatpush3.bf16.msra.mxu1 %v4462_v7  ;;  %2619 = vmatprep.mubr.bf16.mxu1 %v211_v26  ;;  %v4498_v50 = vld [vmem:[%s6066_s2 + $0x130] sm:$0xff]   ;;  %v4491_v52 = vld [vmem:[%s6066_s2 + $0xe8] sm:$0xff]   ;;  %v4501_v53 = vld [vmem:[%s6066_s2 + $0x178] sm:$0xff]  }
  0x10   :  { %3968 = vmatprep.subr.bf16.mxu1 %v4463_v8  ;;  %v25_v54 = vld [vmem:[%s6067_s0 + $0x8] sm:$0xff]  ;;  %v4502_v60 = vld [vmem:[%s6066_s2 + $0x138] sm:$0xff]   ;;  %v26_v0 = vld [vmem:[%s6067_s0 + $0x10] sm:$0xff] }
  0x11   :  { %4009 = vmatpush3.bf16.msra.mxu0 %v4482_v33  ;;  %v81_v55 = vld [vmem:[%s6068_s1 + $0x8] sm:$0xff]  ;;  %v45_v56 = vunpack.c.l.bf16 %v25_v54  ;;  %v46_v57 = vunpack.c.h.bf16 %v25_v54  ;;  %v82_v1 = vld [vmem:[%s6068_s1 + $0x10] sm:$0xff]  ;;  %v47_v3 = vunpack.c.l.bf16 %v26_v0  ;;  %v48_v4 = vunpack.c.h.bf16 %v26_v0  ;;  %v4505_v11 = vld [vmem:[%s6066_s2 + $0x240] sm:$0xff]  }
  0x12   :  { %4010 = vmatprep.subr.bf16.mxu0 %v4485_v37  ;;  %v101_v58 = vunpack.c.l.bf16 %v81_v55  ;;  %v102_v59 = vunpack.c.h.bf16 %v81_v55  ;;  %v4492_v61 = vld [vmem:[%s6066_s2 + $0xa8] sm:$0xff]   ;;  %v4495_v2 = vld [vmem:[%s6066_s2 + $0xf0] sm:$0xff]   ;;  %v103_v5 = vunpack.c.l.bf16 %v82_v1  ;;  %v104_v6 = vunpack.c.h.bf16 %v82_v1  ;;  %v4499_v12 = vld [vmem:[%s6066_s2 + $0xf8] sm:$0xff]  }
  0x13   :  { %3969 = vmatpush3.bf16.msra.mxu1 %v4464_v9  ;;  %v4496_v7 = vld [vmem:[%s6066_s2 + $0xb0] sm:$0xff]   ;;  %v4500_v17 = vld [vmem:[%s6066_s2 + $0xb8] sm:$0xff]   ;;  %v4506_v20 = vld [vmem:[%s6066_s2 + $0x200] sm:$0xff]  }
  0x14   :  { %3970 = vmatprep.subr.bf16.mxu1 %v4465_v10  ;;  %v139_v62 = vsub.f32 %v46_v57, %v102_v59  ;;  %v138_v63 = vsub.f32 %v45_v56, %v101_v58  ;;  %v141_v9 = vsub.f32 %v48_v4, %v104_v6  ;;  %v140_v10 = vsub.f32 %v47_v3, %v103_v5  ;;  %v4509_v21 = vld [vmem:[%s6066_s2 + $0x248] sm:$0xff]   ;;  %v4503_v22 = vld [vmem:[%s6066_s2 + $0x1c0] sm:$0xff]   ;;  %v4513_v26 = vld [vmem:[%s6066_s2 + $0x250] sm:$0xff]  }
  0x15   :  { %4011 = vmatpush3.bf16.msra.mxu0 %v4486_v38  ;;  %v4507_v27 = vld [vmem:[%s6066_s2 + $0x1c8] sm:$0xff]   ;;  %v4514_v29 = vld [vmem:[%s6066_s2 + $0x210] sm:$0xff]   ;;  %v4517_v30 = vld [vmem:[%s6066_s2 + $0x258] sm:$0xff]  }
  0x16   :  { %4012 = vmatprep.subr.bf16.mxu0 %v4489_v41  ;;  %v176_v8 = vand.u32 2147483647, %v139_v62  ;;  %v175_v14 = vand.u32 2147483647, %v138_v63  ;;  %v178_v15 = vand.u32 2147483647, %v141_v9 }
  0x17   :  { %3971 = vmatpush3.bf16.msra.mxu1 %v4466_v13  ;;  %v4512_v32 = vld [vmem:[%s6066_s2 + $0x190] sm:$0xff]   ;;  %v4518_v33 = vld [vmem:[%s6066_s2 + $0x218] sm:$0xff]   ;;  %v4522_v37 = vld [vmem:[%s6066_s2 + $0x220] sm:$0xff]  }
  0x18   :  { %3972 = vmatprep.subr.bf16.mxu1 %v4467_v16  ;;  %v213_v13 = vpack.c.bf16 %v176_v8, %v176_v8  ;;  %v177_v16 = vand.u32 2147483647, %v140_v10  ;;  %v215_v18 = vpack.c.bf16 %v178_v15, %v178_v15  ;;  %v212_v24 = vpack.c.bf16 %v175_v14, %v175_v14  ;;  %v4525_v38 = vld [vmem:[%s6066_s2 + $0x268] sm:$0xff]   ;;  %v4528_v54 = vld [vmem:[%s6066_s2 + $0x1b0] sm:$0xff]   ;;  %v28_v55 = vld [vmem:[%s6067_s0 + $0x20] sm:$0xff] }
  0x19   :  { %4013 = vmatpush3.bf16.msra.mxu0 %v4490_v42  ;;  %v4526_v41 = vld [vmem:[%s6066_s2 + $0x228] sm:$0xff]   ;;  %v4529_v42 = vld [vmem:[%s6066_s2 + $0x270] sm:$0xff]   ;;  %v84_v56 = vld [vmem:[%s6068_s1 + $0x20] sm:$0xff] }
  0x1a   :  { %4014 = vmatprep.subr.bf16.mxu0 %v4493_v45  ;;  %v214_v19 = vpack.c.bf16 %v177_v16, %v177_v16  ;;  %2699 = vmatprep.mubr.bf16.mxu0 %v215_v18  ;;  %v4530_v45 = vld [vmem:[%s6066_s2 + $0x230] sm:$0xff]   ;;  %v4534_v58 = vld [vmem:[%s6066_s2 + $0x238] sm:$0xff]   ;;  %v107_v62 = vunpack.c.l.bf16 %v84_v56  ;;  %v108_v63 = vunpack.c.h.bf16 %v84_v56  ;;  %v4537_v0 = vld [vmem:[%s6066_s2 + $0x340] sm:$0xff]  }
  0x1b   :  { %3973 = vmatpush3.bf16.msra.mxu1 %v4468_v23  ;;  %v4504_v23 = vld [vmem:[%s6066_s2 + $0x180] sm:$0xff]   ;;  %v4531_v1 = vld [vmem:[%s6066_s2 + $0x1f8] sm:$0xff]   ;;  %v4541_v15 = vld [vmem:[%s6066_s2 + $0x348] sm:$0xff]  }
  0x1c   :  { %3974 = vmatprep.subr.bf16.mxu1 %v4469_v25  ;;  %v4510_v25 = vld [vmem:[%s6066_s2 + $0x208] sm:$0xff]   ;;  %v4532_v3 = vld [vmem:[%s6066_s2 + $0x1b8] sm:$0xff]   ;;  %v4535_v10 = vld [vmem:[%s6066_s2 + $0x2c0] sm:$0xff]  }
  0x1d   :  { %4015 = vmatpush3.bf16.msra.mxu0 %v4494_v46  ;;  %v4533_v46 = vld [vmem:[%s6066_s2 + $0x278] sm:$0xff]   ;;  %v4536_v16 = vld [vmem:[%s6066_s2 + $0x280] sm:$0xff]   ;;  %v4542_v18 = vld [vmem:[%s6066_s2 + $0x308] sm:$0xff]  }
  0x1e   :  { %4016 = vmatprep.subr.bf16.mxu0 %v4497_v49 }
  0x1f   :  { %3975 = vmatpush3.bf16.msra.mxu1 %v4470_v28  ;;  %v4508_v28 = vld [vmem:[%s6066_s2 + $0x188] sm:$0xff]  }
  0x20   :  { %3982 = vmatprep.subr.bf16.mxu1 %v4471_v31  ;;  %v4511_v31 = vld [vmem:[%s6066_s2 + $0x1d0] sm:$0xff]  }
  0x21   :  { %4017 = vmatpush3.bf16.msra.mxu0 %v4498_v50  ;;  %v83_v50 = vld [vmem:[%s6068_s1 + $0x18] sm:$0xff] }
  0x22   :  { %2620 = vmatmul.mubr.bf16.vlgmr.msra.gmra.mrb[0].mxu1 %v210_v34  ;;  %4018 = vmatprep.subr.bf16.mxu0 %v4501_v53  ;;  %v4521_v34 = vld [vmem:[%s6066_s2 + $0x260] sm:$0xff]   ;;  %v106_v53 = vunpack.c.h.bf16 %v83_v50 }
  0x23   :  { %3983 = vmatpush3.bf16.msra.mxu1 %v4472_v35  ;;  %2659 = vmatprep.mubr.bf16.mxu1 %v213_v13  ;;  %v4515_v35 = vld [vmem:[%s6066_s2 + $0x1d8] sm:$0xff]   ;;  %v4538_v13 = vld [vmem:[%s6066_s2 + $0x300] sm:$0xff]  }
  0x24   :  { %3984 = vmatprep.subr.bf16.mxu1 %v4475_v36  ;;  %v4516_v36 = vld [vmem:[%s6066_s2 + $0x198] sm:$0xff]  }
  0x25   :  { %4019 = vmatpush3.bf16.msra.mxu0 %v4502_v60  ;;  %v51_v60 = vunpack.c.l.bf16 %v28_v55 }
  0x26   :  { %4048 = vmatprep.subr.bf16.mxu0 %v4505_v11 }
  0x27   :  { %3985 = vmatpush3.bf16.msra.mxu1 %v4476_v39  ;;  %v4519_v39 = vld [vmem:[%s6066_s2 + $0x1e0] sm:$0xff]   ;;  %v144_v5 = vsub.f32 %v51_v60, %v107_v62 }
  0x28   :  { %3986 = vmatprep.subr.bf16.mxu1 %v4479_v40  ;;  %2700 = vmatmul.mubr.bf16.vlgmr.msra.gmra.mrb[0].mxu0 %v214_v19  ;;  %v4520_v40 = vld [vmem:[%s6066_s2 + $0x1a0] sm:$0xff]   ;;  %v4545_v19 = vld [vmem:[%s6066_s2 + $0x350] sm:$0xff]  }
  0x29   :  { %4049 = vmatpush3.bf16.msra.mxu0 %v4506_v20  ;;  %v181_v9 = vand.u32 2147483647, %v144_v5  ;;  %v4540_v20 = vld [vmem:[%s6066_s2 + $0x288] sm:$0xff]   ;;  %v4569_v62 = vld [vmem:[%s6066_s2 + $0x440] sm:$0xff]  }
  0x2a   :  { %4050 = vmatprep.subr.bf16.mxu0 %v4509_v21  ;;  %v4543_v21 = vld [vmem:[%s6066_s2 + $0x2d0] sm:$0xff]  }
  0x2b   :  { %3987 = vmatpush3.bf16.msra.mxu1 %v4480_v43  ;;  %v4523_v43 = vld [vmem:[%s6066_s2 + $0x1e8] sm:$0xff]  }
  0x2c   :  { %3988 = vmatprep.subr.bf16.mxu1 %v4483_v44  ;;  %v4524_v44 = vld [vmem:[%s6066_s2 + $0x1a8] sm:$0xff]  }
  0x2d   :  { %4051 = vmatpush3.bf16.msra.mxu0 %v4510_v25  ;;  %v4547_v25 = vld [vmem:[%s6066_s2 + $0x2d8] sm:$0xff]  }
  0x2e   :  { %4052 = vmatprep.subr.bf16.mxu0 %v4513_v26  ;;  %v4550_v26 = vld [vmem:[%s6066_s2 + $0x318] sm:$0xff]  }
  0x2f   :  { %3989 = vmatpush3.bf16.msra.mxu1 %v4484_v47  ;;  %v27_v47 = vld [vmem:[%s6067_s0 + $0x18] sm:$0xff] }
  0x30   :  { %3990 = vmatprep.subr.bf16.mxu1 %v4487_v48  ;;  %v49_v48 = vunpack.c.l.bf16 %v27_v47  ;;  %v50_v49 = vunpack.c.h.bf16 %v27_v47  ;;  %v4563_v47 = vld [vmem:[%s6066_s2 + $0x2f8] sm:$0xff]  }
  0x31   :  { %4053 = vmatpush3.bf16.msra.mxu0 %v4514_v29  ;;  %v4551_v29 = vld [vmem:[%s6066_s2 + $0x2e0] sm:$0xff]  }
  0x32   :  { %4054 = vmatprep.subr.bf16.mxu0 %v4517_v30  ;;  %v143_v57 = vsub.f32 %v50_v49, %v106_v53  ;;  %v4554_v30 = vld [vmem:[%s6066_s2 + $0x320] sm:$0xff]   ;;  %v4566_v53 = vld [vmem:[%s6066_s2 + $0x338] sm:$0xff]  }
  0x33   :  { %3991 = vmatpush3.bf16.msra.mxu1 %v4488_v51  ;;  %v4527_v51 = vld [vmem:[%s6066_s2 + $0x1f0] sm:$0xff]  }
  0x34   :  { %3992 = vmatprep.subr.bf16.mxu1 %v4491_v52  ;;  %v105_v52 = vunpack.c.l.bf16 %v83_v50  ;;  %v30_v50 = vld [vmem:[%s6067_s0 + $0x30] sm:$0xff] }
  0x35   :  { %4055 = vmatpush3.bf16.msra.mxu0 %v4518_v33  ;;  %v4555_v33 = vld [vmem:[%s6066_s2 + $0x2e8] sm:$0xff]  }
  0x36   :  { %4056 = vmatprep.subr.bf16.mxu0 %v4521_v34  ;;  %v142_v59 = vsub.f32 %v49_v48, %v105_v52  ;;  %v4558_v34 = vld [vmem:[%s6066_s2 + $0x328] sm:$0xff]   ;;  %v4564_v52 = vld [vmem:[%s6066_s2 + $0x2b8] sm:$0xff]  }
  0x37   :  { %3993 = vmatpush3.bf16.msra.mxu1 %v4492_v61  ;;  %v52_v61 = vunpack.c.h.bf16 %v28_v55  ;;  %v56_v55 = vunpack.c.h.bf16 %v30_v50 }
  0x38   :  { %3994 = vmatprep.subr.bf16.mxu1 %v4495_v2  ;;  %v180_v2 = vand.u32 2147483647, %v143_v57 }
  0x39   :  { %4057 = vmatpush3.bf16.msra.mxu0 %v4522_v37  ;;  %v145_v4 = vsub.f32 %v52_v61, %v108_v63  ;;  %v4559_v37 = vld [vmem:[%s6066_s2 + $0x2f0] sm:$0xff]  }
  0x3a   :  { %4058 = vmatprep.subr.bf16.mxu0 %v4525_v38  ;;  %v217_v6 = vpack.c.bf16 %v180_v2, %v180_v2  ;;  %v4560_v38 = vld [vmem:[%s6066_s2 + $0x2b0] sm:$0xff]   ;;  %v4568_v2 = vld [vmem:[%s6066_s2 + $0x380] sm:$0xff]  }
  0x3b   :  { %3995 = vmatpush3.bf16.msra.mxu1 %v4496_v7  ;;  %v179_v7 = vand.u32 2147483647, %v142_v59  ;;  %v182_v8 = vand.u32 2147483647, %v145_v4  ;;  %v4570_v4 = vld [vmem:[%s6066_s2 + $0x400] sm:$0xff]  }
  0x3c   :  { %3996 = vmatprep.subr.bf16.mxu1 %v4499_v12  ;;  %v218_v12 = vpack.c.bf16 %v181_v9, %v181_v9  ;;  %v4573_v9 = vld [vmem:[%s6066_s2 + $0x448] sm:$0xff]  }
  0x3d   :  { %4059 = vmatpush3.bf16.msra.mxu0 %v4526_v41  ;;  %v219_v11 = vpack.c.bf16 %v182_v8, %v182_v8  ;;  %v216_v14 = vpack.c.bf16 %v179_v7, %v179_v7  ;;  %v85_v41 = vld [vmem:[%s6068_s1 + $0x28] sm:$0xff] }
  0x3e   :  { %4060 = vmatprep.subr.bf16.mxu0 %v4529_v42  ;;  %v4565_v42 = vld [vmem:[%s6066_s2 + $0x378] sm:$0xff]   ;;  %v4571_v8 = vld [vmem:[%s6066_s2 + $0x3c8] sm:$0xff]  }
  0x3f   :  { %3997 = vmatpush3.bf16.msra.mxu1 %v4500_v17  ;;  %2779 = vmatprep.mubr.bf16.mxu0 %v219_v11  ;;  %v4539_v17 = vld [vmem:[%s6066_s2 + $0x2c8] sm:$0xff]  }
  0x40   :  { %4026 = vmatprep.subr.bf16.mxu1 %v4503_v22  ;;  %v4546_v22 = vld [vmem:[%s6066_s2 + $0x310] sm:$0xff]   ;;  %v4574_v11 = vld [vmem:[%s6066_s2 + $0x408] sm:$0xff]  }
  0x41   :  { %4061 = vmatpush3.bf16.msra.mxu0 %v4530_v45  ;;  %v109_v45 = vunpack.c.l.bf16 %v85_v41 }
  0x42   :  { %2660 = vmatmul.mubr.bf16.vlgmr.msra.gmra.mrb[4].mxu1 %v212_v24  ;;  %4062 = vmatprep.subr.bf16.mxu0 %v4533_v46  ;;  %v4544_v24 = vld [vmem:[%s6066_s2 + $0x290] sm:$0xff]   ;;  %v110_v46 = vunpack.c.h.bf16 %v85_v41  ;;  %v4598_v41 = vld [vmem:[%s6066_s2 + $0x438] sm:$0xff]  }
  0x43   :  { %4027 = vmatpush3.bf16.msra.mxu1 %v4504_v23  ;;  %2739 = vmatprep.mubr.bf16.mxu1 %v217_v6  ;;  %v4549_v23 = vld [vmem:[%s6066_s2 + $0x358] sm:$0xff]  }
  0x44   :  { %4028 = vmatprep.subr.bf16.mxu1 %v4507_v27  ;;  %v4553_v27 = vld [vmem:[%s6066_s2 + $0x360] sm:$0xff]  }
  0x45   :  { %4063 = vmatpush3.bf16.msra.mxu0 %v4534_v58 }
  0x46   :  { %4092 = vmatprep.subr.bf16.mxu0 %v4537_v0  ;;  %v4567_v0 = vld [vmem:[%s6066_s2 + $0x3c0] sm:$0xff]  }
  0x47   :  { %4029 = vmatpush3.bf16.msra.mxu1 %v4508_v28  ;;  %v4548_v28 = vld [vmem:[%s6066_s2 + $0x298] sm:$0xff]  }
  0x48   :  { %4030 = vmatprep.subr.bf16.mxu1 %v4511_v31  ;;  %2780 = vmatmul.mubr.bf16.vlgmr.msra.gmra.mrb[4].mxu0 %v218_v12  ;;  %v4557_v31 = vld [vmem:[%s6066_s2 + $0x368] sm:$0xff]   ;;  %v4575_v12 = vld [vmem:[%s6066_s2 + $0x3d0] sm:$0xff]  }
  0x49   :  { %4093 = vmatpush3.bf16.msra.mxu0 %v4538_v13  ;;  %v4577_v13 = vld [vmem:[%s6066_s2 + $0x450] sm:$0xff]  }
  0x4a   :  { %4094 = vmatprep.subr.bf16.mxu0 %v4541_v15  ;;  %v4578_v15 = vld [vmem:[%s6066_s2 + $0x410] sm:$0xff]  }
  0x4b   :  { %4031 = vmatpush3.bf16.msra.mxu1 %v4512_v32  ;;  %v4552_v32 = vld [vmem:[%s6066_s2 + $0x2a0] sm:$0xff]  }
  0x4c   :  { %4032 = vmatprep.subr.bf16.mxu1 %v4515_v35  ;;  %v4561_v35 = vld [vmem:[%s6066_s2 + $0x370] sm:$0xff]  }
  0x4d   :  { %4095 = vmatpush3.bf16.msra.mxu0 %v4542_v18  ;;  %v4580_v18 = vld [vmem:[%s6066_s2 + $0x398] sm:$0xff]  }
  0x4e   :  { %4096 = vmatprep.subr.bf16.mxu0 %v4545_v19  ;;  %v4582_v19 = vld [vmem:[%s6066_s2 + $0x418] sm:$0xff]  }
  0x4f   :  { %4033 = vmatpush3.bf16.msra.mxu1 %v4516_v36  ;;  %v4556_v36 = vld [vmem:[%s6066_s2 + $0x2a8] sm:$0xff]  }
  0x50   :  { %4034 = vmatprep.subr.bf16.mxu1 %v4519_v39  ;;  %v4562_v39 = vld [vmem:[%s6066_s2 + $0x330] sm:$0xff]  }
  0x51   :  { %4097 = vmatpush3.bf16.msra.mxu0 %v4546_v22  ;;  %v4584_v22 = vld [vmem:[%s6066_s2 + $0x3a0] sm:$0xff]  }
  0x52   :  { %4098 = vmatprep.subr.bf16.mxu0 %v4549_v23  ;;  %v4586_v23 = vld [vmem:[%s6066_s2 + $0x420] sm:$0xff]  }
  0x53   :  { %4035 = vmatpush3.bf16.msra.mxu1 %v4520_v40  ;;  %v29_v40 = vld [vmem:[%s6067_s0 + $0x28] sm:$0xff] }
  0x54   :  { %4036 = vmatprep.subr.bf16.mxu1 %v4523_v43  ;;  %v53_v43 = vunpack.c.l.bf16 %v29_v40 }
  0x55   :  { %4099 = vmatpush3.bf16.msra.mxu0 %v4550_v26  ;;  %v4588_v26 = vld [vmem:[%s6066_s2 + $0x3a8] sm:$0xff]  }
  0x56   :  { %4100 = vmatprep.subr.bf16.mxu0 %v4553_v27  ;;  %v146_v49 = vsub.f32 %v53_v43, %v109_v45  ;;  %v4590_v27 = vld [vmem:[%s6066_s2 + $0x428] sm:$0xff]   ;;  %v88_v43 = vld [vmem:[%s6068_s1 + $0x40] sm:$0xff] }
  0x57   :  { %4037 = vmatpush3.bf16.msra.mxu1 %v4524_v44  ;;  %v54_v44 = vunpack.c.h.bf16 %v29_v40 }
  0x58   :  { %4038 = vmatprep.subr.bf16.mxu1 %v4527_v51  ;;  %v86_v51 = vld [vmem:[%s6068_s1 + $0x30] sm:$0xff]  ;;  %v183_v59 = vand.u32 2147483647, %v146_v49  ;;  %v115_v49 = vunpack.c.l.bf16 %v88_v43 }
  0x59   :  { %4101 = vmatpush3.bf16.msra.mxu0 %v4554_v30  ;;  %v147_v48 = vsub.f32 %v54_v44, %v110_v46  ;;  %v111_v56 = vunpack.c.l.bf16 %v86_v51  ;;  %v112_v57 = vunpack.c.h.bf16 %v86_v51  ;;  %v4592_v30 = vld [vmem:[%s6066_s2 + $0x3b0] sm:$0xff]   ;;  %v4599_v46 = vld [vmem:[%s6066_s2 + $0x4c0] sm:$0xff]  }
  0x5a   :  { %4102 = vmatprep.subr.bf16.mxu0 %v4557_v31  ;;  %v220_v5 = vpack.c.bf16 %v183_v59, %v183_v59  ;;  %v4594_v31 = vld [vmem:[%s6066_s2 + $0x430] sm:$0xff]   ;;  %v4601_v51 = vld [vmem:[%s6066_s2 + $0x540] sm:$0xff]   ;;  %v4603_v59 = vld [vmem:[%s6066_s2 + $0x4c8] sm:$0xff]  }
  0x5b   :  { %4039 = vmatpush3.bf16.msra.mxu1 %v4528_v54  ;;  %v55_v54 = vunpack.c.l.bf16 %v30_v50  ;;  %v184_v58 = vand.u32 2147483647, %v147_v48  ;;  %v149_v60 = vsub.f32 %v56_v55, %v112_v57  ;;  %v116_v50 = vunpack.c.h.bf16 %v88_v43  ;;  %v4600_v55 = vld [vmem:[%s6066_s2 + $0x480] sm:$0xff]  }
  0x5c   :  { %4040 = vmatprep.subr.bf16.mxu1 %v4531_v1 }
  0x5d   :  { %4103 = vmatpush3.bf16.msra.mxu0 %v4558_v34  ;;  %v148_v61 = vsub.f32 %v55_v54, %v111_v56  ;;  %v221_v63 = vpack.c.bf16 %v184_v58, %v184_v58  ;;  %v186_v1 = vand.u32 2147483647, %v149_v60  ;;  %v31_v34 = vld [vmem:[%s6067_s0 + $0x38] sm:$0xff] }
  0x5e   :  { %4104 = vmatprep.subr.bf16.mxu0 %v4561_v35  ;;  %v57_v35 = vunpack.c.l.bf16 %v31_v34 }
  0x5f   :  { %4041 = vmatpush3.bf16.msra.mxu1 %v4532_v3  ;;  %v185_v3 = vand.u32 2147483647, %v148_v61  ;;  %v223_v6 = vpack.c.bf16 %v186_v1, %v186_v1  ;;  %v4604_v1 = vld [vmem:[%s6066_s2 + $0x488] sm:$0xff]  }
  0x60   :  { %4070 = vmatprep.subr.bf16.mxu1 %v4535_v10  ;;  %v4572_v10 = vld [vmem:[%s6066_s2 + $0x388] sm:$0xff]  }
  0x61   :  { %4105 = vmatpush3.bf16.msra.mxu0 %v4562_v39  ;;  %v222_v7 = vpack.c.bf16 %v185_v3, %v185_v3  ;;  %2859 = vmatprep.mubr.bf16.mxu0 %v223_v6  ;;  %v4607_v3 = vld [vmem:[%s6066_s2 + $0x4d0] sm:$0xff]  }
  0x62   :  { %2740 = vmatmul.mubr.bf16.vlgmr.msra.gmra.mrb[8].mxu1 %v216_v14  ;;  %4106 = vmatprep.subr.bf16.mxu0 %v4565_v42  ;;  %v4576_v14 = vld [vmem:[%s6066_s2 + $0x390] sm:$0xff]   ;;  %v32_v42 = vld [vmem:[%s6067_s0 + $0x40] sm:$0xff] }
  0x63   :  { %4071 = vmatpush3.bf16.msra.mxu1 %v4536_v16  ;;  %2819 = vmatprep.mubr.bf16.mxu1 %v221_v63  ;;  %v4579_v16 = vld [vmem:[%s6066_s2 + $0x3d8] sm:$0xff]   ;;  %v60_v48 = vunpack.c.h.bf16 %v32_v42  ;;  %v4609_v6 = vld [vmem:[%s6066_s2 + $0x550] sm:$0xff]  }
  0x64   :  { %4072 = vmatprep.subr.bf16.mxu1 %v4539_v17  ;;  %v4581_v17 = vld [vmem:[%s6066_s2 + $0x458] sm:$0xff]  }
  0x65   :  { %4107 = vmatpush3.bf16.msra.mxu0 %v4566_v53  ;;  %v153_v54 = vsub.f32 %v60_v48, %v116_v50  ;;  %v4632_v50 = vld [vmem:[%s6066_s2 + $0x580] sm:$0xff]  }
  0x66   :  { %4136 = vmatprep.subr.bf16.mxu0 %v4569_v62  ;;  %v4602_v62 = vld [vmem:[%s6066_s2 + $0x500] sm:$0xff]  }
  0x67   :  { %4073 = vmatpush3.bf16.msra.mxu1 %v4540_v20  ;;  %v4583_v20 = vld [vmem:[%s6066_s2 + $0x3e0] sm:$0xff]   ;;  %v190_v60 = vand.u32 2147483647, %v153_v54  ;;  %v4635_v54 = vld [vmem:[%s6066_s2 + $0x5c8] sm:$0xff]  }
  0x68   :  { %4074 = vmatprep.subr.bf16.mxu1 %v4543_v21  ;;  %2860 = vmatmul.mubr.bf16.vlgmr.msra.gmra.mrb[8].mxu0 %v222_v7  ;;  %v4585_v21 = vld [vmem:[%s6066_s2 + $0x460] sm:$0xff]   ;;  %v4611_v7 = vld [vmem:[%s6066_s2 + $0x4d8] sm:$0xff]  }
  0x69   :  { %4137 = vmatpush3.bf16.msra.mxu0 %v4570_v4  ;;  %v227_v63 = vpack.c.bf16 %v190_v60, %v190_v60  ;;  %v4606_v4 = vld [vmem:[%s6066_s2 + $0x508] sm:$0xff]  }
  0x6a   :  { %4138 = vmatprep.subr.bf16.mxu0 %v4573_v9  ;;  %v4612_v9 = vld [vmem:[%s6066_s2 + $0x498] sm:$0xff]   ;;  %v4638_v60 = vld [vmem:[%s6066_s2 + $0x608] sm:$0xff]  }
  0x6b   :  { %4075 = vmatpush3.bf16.msra.mxu1 %v4544_v24  ;;  %v4587_v24 = vld [vmem:[%s6066_s2 + $0x3e8] sm:$0xff]   ;;  %2939 = vmatprep.mubr.bf16.mxu0 %v227_v63  ;;  %v4643_v63 = vld [vmem:[%s6066_s2 + $0x5d8] sm:$0xff]  }
  0x6c   :  { %4076 = vmatprep.subr.bf16.mxu1 %v4547_v25  ;;  %v4589_v25 = vld [vmem:[%s6066_s2 + $0x468] sm:$0xff]  }
  0x6d   :  { %4139 = vmatpush3.bf16.msra.mxu0 %v4574_v11  ;;  %v4615_v11 = vld [vmem:[%s6066_s2 + $0x4e0] sm:$0xff]  }
  0x6e   :  { %4140 = vmatprep.subr.bf16.mxu0 %v4577_v13  ;;  %v4616_v13 = vld [vmem:[%s6066_s2 + $0x4a0] sm:$0xff]  }
  0x6f   :  { %4077 = vmatpush3.bf16.msra.mxu1 %v4548_v28  ;;  %v4591_v28 = vld [vmem:[%s6066_s2 + $0x3f0] sm:$0xff]  }
  0x70   :  { %4078 = vmatprep.subr.bf16.mxu1 %v4551_v29  ;;  %v4593_v29 = vld [vmem:[%s6066_s2 + $0x470] sm:$0xff]  }
  0x71   :  { %4141 = vmatpush3.bf16.msra.mxu0 %v4578_v15  ;;  %v4619_v15 = vld [vmem:[%s6066_s2 + $0x4e8] sm:$0xff]  }
  0x72   :  { %4142 = vmatprep.subr.bf16.mxu0 %v4581_v17  ;;  %v4620_v17 = vld [vmem:[%s6066_s2 + $0x4a8] sm:$0xff]  }
  0x73   :  { %4079 = vmatpush3.bf16.msra.mxu1 %v4552_v32  ;;  %v4595_v32 = vld [vmem:[%s6066_s2 + $0x3f8] sm:$0xff]  }
  0x74   :  { %4080 = vmatprep.subr.bf16.mxu1 %v4555_v33  ;;  %v4597_v33 = vld [vmem:[%s6066_s2 + $0x478] sm:$0xff]  }
  0x75   :  { %4143 = vmatpush3.bf16.msra.mxu0 %v4582_v19  ;;  %v4623_v19 = vld [vmem:[%s6066_s2 + $0x4f0] sm:$0xff]  }
  0x76   :  { %4144 = vmatprep.subr.bf16.mxu0 %v4585_v21  ;;  %v4624_v21 = vld [vmem:[%s6066_s2 + $0x4b0] sm:$0xff]  }
  0x77   :  { %4081 = vmatpush3.bf16.msra.mxu1 %v4556_v36  ;;  %v58_v36 = vunpack.c.h.bf16 %v31_v34 }
  0x78   :  { %4082 = vmatprep.subr.bf16.mxu1 %v4559_v37  ;;  %v87_v37 = vld [vmem:[%s6068_s1 + $0x38] sm:$0xff] }
  0x79   :  { %4145 = vmatpush3.bf16.msra.mxu0 %v4586_v23  ;;  %v113_v39 = vunpack.c.l.bf16 %v87_v37  ;;  %v114_v40 = vunpack.c.h.bf16 %v87_v37  ;;  %v4627_v23 = vld [vmem:[%s6066_s2 + $0x4f8] sm:$0xff]   ;;  %v90_v37 = vld [vmem:[%s6068_s1 + $0x50] sm:$0xff] }
  0x7a   :  { %4146 = vmatprep.subr.bf16.mxu0 %v4589_v25  ;;  %v4628_v25 = vld [vmem:[%s6066_s2 + $0x4b8] sm:$0xff]  }
  0x7b   :  { %4083 = vmatpush3.bf16.msra.mxu1 %v4560_v38  ;;  %v4596_v38 = vld [vmem:[%s6066_s2 + $0x3b8] sm:$0xff]   ;;  %v151_v44 = vsub.f32 %v58_v36, %v114_v40  ;;  %v150_v45 = vsub.f32 %v57_v35, %v113_v39  ;;  %v34_v36 = vld [vmem:[%s6067_s0 + $0x50] sm:$0xff] }
  0x7c   :  { %4084 = vmatprep.subr.bf16.mxu1 %v4563_v47  ;;  %v59_v47 = vunpack.c.l.bf16 %v32_v42  ;;  %v63_v39 = vunpack.c.l.bf16 %v34_v36  ;;  %v64_v40 = vunpack.c.h.bf16 %v34_v36  ;;  %v120_v42 = vunpack.c.h.bf16 %v90_v37 }
  0x7d   :  { %4147 = vmatpush3.bf16.msra.mxu0 %v4590_v27  ;;  %v187_v53 = vand.u32 2147483647, %v150_v45  ;;  %v89_v27 = vld [vmem:[%s6068_s1 + $0x48] sm:$0xff] }
  0x7e   :  { %4148 = vmatprep.subr.bf16.mxu0 %v4593_v29  ;;  %v152_v56 = vsub.f32 %v59_v47, %v115_v49  ;;  %v157_v45 = vsub.f32 %v64_v40, %v120_v42  ;;  %v4633_v47 = vld [vmem:[%s6066_s2 + $0x640] sm:$0xff]  }
  0x7f   :  { %4085 = vmatpush3.bf16.msra.mxu1 %v4564_v52  ;;  %v188_v52 = vand.u32 2147483647, %v151_v44  ;;  %v224_v58 = vpack.c.bf16 %v187_v53, %v187_v53  ;;  %v4634_v53 = vld [vmem:[%s6066_s2 + $0x600] sm:$0xff]  }
  0x80   :  { %4114 = vmatprep.subr.bf16.mxu1 %v4567_v0  ;;  %v189_v61 = vand.u32 2147483647, %v152_v56 }
  0x81   :  { %4149 = vmatpush3.bf16.msra.mxu0 %v4594_v31  ;;  %v225_v57 = vpack.c.bf16 %v188_v52, %v188_v52  ;;  %v117_v31 = vunpack.c.l.bf16 %v89_v27 }
  0x82   :  { %2820 = vmatmul.mubr.bf16.vlgmr.msra.gmra.mrb[12].mxu1 %v220_v5  ;;  %4150 = vmatprep.subr.bf16.mxu0 %v4597_v33  ;;  %v226_v0 = vpack.c.bf16 %v189_v61, %v189_v61  ;;  %v4608_v5 = vld [vmem:[%s6066_s2 + $0x490] sm:$0xff]   ;;  %v4631_v33 = vld [vmem:[%s6066_s2 + $0x5c0] sm:$0xff]  }
  0x83   :  { %4115 = vmatpush3.bf16.msra.mxu1 %v4568_v2  ;;  %2899 = vmatprep.mubr.bf16.mxu1 %v225_v57  ;;  %v4605_v2 = vld [vmem:[%s6066_s2 + $0x548] sm:$0xff]   ;;  %v4640_v61 = vld [vmem:[%s6066_s2 + $0x590] sm:$0xff]  }
  0x84   :  { %4116 = vmatprep.subr.bf16.mxu1 %v4571_v8  ;;  %v4610_v8 = vld [vmem:[%s6066_s2 + $0x510] sm:$0xff]   ;;  %v4636_v57 = vld [vmem:[%s6066_s2 + $0x588] sm:$0xff]  }
  0x85   :  { %4151 = vmatpush3.bf16.msra.mxu0 %v4598_v41  ;;  %v119_v41 = vunpack.c.l.bf16 %v90_v37 }
  0x86   :  { %4180 = vmatprep.subr.bf16.mxu0 %v4601_v51  ;;  %v194_v51 = vand.u32 2147483647, %v157_v45 }
  0x87   :  { %4117 = vmatpush3.bf16.msra.mxu1 %v4572_v10  ;;  %v4613_v10 = vld [vmem:[%s6066_s2 + $0x558] sm:$0xff]  }
  0x88   :  { %4118 = vmatprep.subr.bf16.mxu1 %v4575_v12  ;;  %2940 = vmatmul.mubr.bf16.vlgmr.msra.gmra.mrb[12].mxu0 %v226_v0  ;;  %v4614_v12 = vld [vmem:[%s6066_s2 + $0x518] sm:$0xff]   ;;  %v4642_v0 = vld [vmem:[%s6066_s2 + $0x610] sm:$0xff]  }
  0x89   :  { %4181 = vmatpush3.bf16.msra.mxu0 %v4602_v62  ;;  %v4641_v62 = vld [vmem:[%s6066_s2 + $0x650] sm:$0xff]  }
  0x8a   :  { %4182 = vmatprep.subr.bf16.mxu0 %v4605_v2  ;;  %v4645_v2 = vld [vmem:[%s6066_s2 + $0x658] sm:$0xff]  }
  0x8b   :  { %4119 = vmatpush3.bf16.msra.mxu1 %v4576_v14  ;;  %v4617_v14 = vld [vmem:[%s6066_s2 + $0x560] sm:$0xff]  }
  0x8c   :  { %4120 = vmatprep.subr.bf16.mxu1 %v4579_v16  ;;  %v4618_v16 = vld [vmem:[%s6066_s2 + $0x520] sm:$0xff]  }
  0x8d   :  { %4183 = vmatpush3.bf16.msra.mxu0 %v4606_v4  ;;  %v4646_v4 = vld [vmem:[%s6066_s2 + $0x618] sm:$0xff]  }
  0x8e   :  { %4184 = vmatprep.subr.bf16.mxu0 %v4609_v6  ;;  %v4649_v6 = vld [vmem:[%s6066_s2 + $0x660] sm:$0xff]  }
  0x8f   :  { %4121 = vmatpush3.bf16.msra.mxu1 %v4580_v18  ;;  %v4621_v18 = vld [vmem:[%s6066_s2 + $0x568] sm:$0xff]  }
  0x90   :  { %4122 = vmatprep.subr.bf16.mxu1 %v4583_v20  ;;  %v4622_v20 = vld [vmem:[%s6066_s2 + $0x528] sm:$0xff]  }
  0x91   :  { %4185 = vmatpush3.bf16.msra.mxu0 %v4610_v8  ;;  %v4650_v8 = vld [vmem:[%s6066_s2 + $0x620] sm:$0xff]  }
  0x92   :  { %4186 = vmatprep.subr.bf16.mxu0 %v4613_v10  ;;  %v4653_v10 = vld [vmem:[%s6066_s2 + $0x668] sm:$0xff]  }
  0x93   :  { %4123 = vmatpush3.bf16.msra.mxu1 %v4584_v22  ;;  %v4625_v22 = vld [vmem:[%s6066_s2 + $0x570] sm:$0xff]  }
  0x94   :  { %4124 = vmatprep.subr.bf16.mxu1 %v4587_v24  ;;  %v4626_v24 = vld [vmem:[%s6066_s2 + $0x530] sm:$0xff]  }
  0x95   :  { %4187 = vmatpush3.bf16.msra.mxu0 %v4614_v12  ;;  %v4654_v12 = vld [vmem:[%s6066_s2 + $0x628] sm:$0xff]  }
  0x96   :  { %4188 = vmatprep.subr.bf16.mxu0 %v4617_v14  ;;  %v4657_v14 = vld [vmem:[%s6066_s2 + $0x670] sm:$0xff]  }
  0x97   :  { %4125 = vmatpush3.bf16.msra.mxu1 %v4588_v26  ;;  %v33_v26 = vld [vmem:[%s6067_s0 + $0x48] sm:$0xff] }
  0x98   :  { %4126 = vmatprep.subr.bf16.mxu1 %v4591_v28  ;;  %v4629_v28 = vld [vmem:[%s6066_s2 + $0x578] sm:$0xff]   ;;  %v61_v29 = vunpack.c.l.bf16 %v33_v26 }
  0x99   :  { %4189 = vmatpush3.bf16.msra.mxu0 %v4618_v16  ;;  %v4659_v16 = vld [vmem:[%s6066_s2 + $0x5f8] sm:$0xff]  }
  0x9a   :  { %4190 = vmatprep.subr.bf16.mxu0 %v4621_v18  ;;  %v154_v35 = vsub.f32 %v61_v29, %v117_v31  ;;  %v4661_v18 = vld [vmem:[%s6066_s2 + $0x678] sm:$0xff]  }
  0x9b   :  { %4127 = vmatpush3.bf16.msra.mxu1 %v4592_v30  ;;  %v62_v30 = vunpack.c.h.bf16 %v33_v26  ;;  %v36_v26 = vld [vmem:[%s6067_s0 + $0x60] sm:$0xff]  ;;  %v4662_v29 = vld [vmem:[%s6066_s2 + $0x638] sm:$0xff]  }
  0x9c   :  { %4128 = vmatprep.subr.bf16.mxu1 %v4595_v32  ;;  %v118_v32 = vunpack.c.h.bf16 %v89_v27  ;;  %v191_v44 = vand.u32 2147483647, %v154_v35  ;;  %v92_v27 = vld [vmem:[%s6068_s1 + $0x60] sm:$0xff]  ;;  %v67_v31 = vunpack.c.l.bf16 %v36_v26 }
  0x9d   :  { %4191 = vmatpush3.bf16.msra.mxu0 %v4622_v20  ;;  %v4665_v35 = vld [vmem:[%s6066_s2 + $0x740] sm:$0xff]  }
  0x9e   :  { %4192 = vmatprep.subr.bf16.mxu0 %v4625_v22  ;;  %v155_v34 = vsub.f32 %v62_v30, %v118_v32  ;;  %v228_v49 = vpack.c.bf16 %v191_v44, %v191_v44  ;;  %v91_v22 = vld [vmem:[%s6068_s1 + $0x58] sm:$0xff]  ;;  %v68_v32 = vunpack.c.h.bf16 %v36_v26  ;;  %v94_v26 = vld [vmem:[%s6068_s1 + $0x70] sm:$0xff] }
  0x9f   :  { %4129 = vmatpush3.bf16.msra.mxu1 %v4596_v38  ;;  %v4630_v38 = vld [vmem:[%s6066_s2 + $0x538] sm:$0xff]  }
  0xa0   :  { %4158 = vmatprep.subr.bf16.mxu1 %v4599_v46  ;;  %v192_v43 = vand.u32 2147483647, %v155_v34  ;;  %v156_v46 = vsub.f32 %v63_v39, %v119_v41  ;;  %v124_v34 = vunpack.c.h.bf16 %v92_v27  ;;  %v4664_v39 = vld [vmem:[%s6066_s2 + $0x680] sm:$0xff]  }
  0xa1   :  { %4193 = vmatpush3.bf16.msra.mxu0 %v4626_v24  ;;  %v122_v24 = vunpack.c.h.bf16 %v91_v22 }
  0xa2   :  { %2900 = vmatmul.mubr.bf16.vlgmr.msra.gmra.mrb[16].mxu1 %v224_v58  ;;  %4194 = vmatprep.subr.bf16.mxu0 %v4629_v28  ;;  %v229_v48 = vpack.c.bf16 %v192_v43, %v192_v43  ;;  %v193_v52 = vand.u32 2147483647, %v156_v46  ;;  %v4637_v58 = vld [vmem:[%s6066_s2 + $0x648] sm:$0xff]   ;;  %v4666_v46 = vld [vmem:[%s6066_s2 + $0x700] sm:$0xff]  }
  0xa3   :  { %4159 = vmatpush3.bf16.msra.mxu1 %v4600_v55  ;;  %v231_v55 = vpack.c.bf16 %v194_v51, %v194_v51  ;;  %v4667_v43 = vld [vmem:[%s6066_s2 + $0x6c8] sm:$0xff]   ;;  %v4671_v51 = vld [vmem:[%s6066_s2 + $0x6d0] sm:$0xff]  }
  0xa4   :  { %4160 = vmatprep.subr.bf16.mxu1 %v4603_v59  ;;  %2979 = vmatprep.mubr.bf16.mxu1 %v229_v48  ;;  %v230_v56 = vpack.c.bf16 %v193_v52, %v193_v52  ;;  %v4639_v59 = vld [vmem:[%s6066_s2 + $0x5d0] sm:$0xff]   ;;  %v4670_v52 = vld [vmem:[%s6066_s2 + $0x708] sm:$0xff]  }
  0xa5   :  { %4195 = vmatpush3.bf16.msra.mxu0 %v4630_v38  ;;  %3019 = vmatprep.mubr.bf16.mxu0 %v231_v55  ;;  %v161_v38 = vsub.f32 %v68_v32, %v124_v34  ;;  %v4675_v55 = vld [vmem:[%s6066_s2 + $0x6d8] sm:$0xff]  }
  0xa6   :  { %4224 = vmatprep.subr.bf16.mxu0 %v4633_v47 }
  0xa7   :  { %4161 = vmatpush3.bf16.msra.mxu1 %v4604_v1  ;;  %v4644_v1 = vld [vmem:[%s6066_s2 + $0x598] sm:$0xff]   ;;  %v198_v44 = vand.u32 2147483647, %v161_v38 }
  0xa8   :  { %4162 = vmatprep.subr.bf16.mxu1 %v4607_v3  ;;  %3020 = vmatmul.mubr.bf16.vlgmr.msra.gmra.mrb[16].mxu0 %v230_v56  ;;  %v4647_v3 = vld [vmem:[%s6066_s2 + $0x5e0] sm:$0xff]   ;;  %v4674_v56 = vld [vmem:[%s6066_s2 + $0x710] sm:$0xff]  }
  0xa9   :  { %4225 = vmatpush3.bf16.msra.mxu0 %v4634_v53  ;;  %v235_v47 = vpack.c.bf16 %v198_v44, %v198_v44  ;;  %v4672_v53 = vld [vmem:[%s6066_s2 + $0x690] sm:$0xff]  }
  0xaa   :  { %4226 = vmatprep.subr.bf16.mxu0 %v4637_v58  ;;  %v4677_v58 = vld [vmem:[%s6066_s2 + $0x758] sm:$0xff]  }
  0xab   :  { %4163 = vmatpush3.bf16.msra.mxu1 %v4608_v5  ;;  %v4648_v5 = vld [vmem:[%s6066_s2 + $0x5a0] sm:$0xff]   ;;  %3099 = vmatprep.mubr.bf16.mxu0 %v235_v47  ;;  %v4701_v47 = vld [vmem:[%s6066_s2 + $0x848] sm:$0xff]  }
  0xac   :  { %4164 = vmatprep.subr.bf16.mxu1 %v4611_v7  ;;  %v4651_v7 = vld [vmem:[%s6066_s2 + $0x5e8] sm:$0xff]  }
  0xad   :  { %4227 = vmatpush3.bf16.msra.mxu0 %v4638_v60  ;;  %v4678_v60 = vld [vmem:[%s6066_s2 + $0x718] sm:$0xff]  }
  0xae   :  { %4228 = vmatprep.subr.bf16.mxu0 %v4641_v62  ;;  %v4681_v62 = vld [vmem:[%s6066_s2 + $0x760] sm:$0xff]  }
  0xaf   :  { %4165 = vmatpush3.bf16.msra.mxu1 %v4612_v9  ;;  %v4652_v9 = vld [vmem:[%s6066_s2 + $0x5a8] sm:$0xff]  }
  0xb0   :  { %4166 = vmatprep.subr.bf16.mxu1 %v4615_v11  ;;  %v4655_v11 = vld [vmem:[%s6066_s2 + $0x5f0] sm:$0xff]  }
  0xb1   :  { %4229 = vmatpush3.bf16.msra.mxu0 %v4642_v0  ;;  %v4683_v0 = vld [vmem:[%s6066_s2 + $0x6e8] sm:$0xff]  }
  0xb2   :  { %4230 = vmatprep.subr.bf16.mxu0 %v4645_v2 }
  0xb3   :  { %4167 = vmatpush3.bf16.msra.mxu1 %v4616_v13  ;;  %v4656_v13 = vld [vmem:[%s6066_s2 + $0x5b0] sm:$0xff]  }
  0xb4   :  { %4168 = vmatprep.subr.bf16.mxu1 %v4619_v15  ;;  %v4658_v15 = vld [vmem:[%s6066_s2 + $0x630] sm:$0xff]  }
  0xb5   :  { %4231 = vmatpush3.bf16.msra.mxu0 %v4646_v4 }
  0xb6   :  { %4232 = vmatprep.subr.bf16.mxu0 %v4649_v6 }
  0xb7   :  { %4169 = vmatpush3.bf16.msra.mxu1 %v4620_v17  ;;  %v4660_v17 = vld [vmem:[%s6066_s2 + $0x5b8] sm:$0xff]  }
  0xb8   :  { %4170 = vmatprep.subr.bf16.mxu1 %v4623_v19  ;;  %v35_v19 = vld [vmem:[%s6067_s0 + $0x58] sm:$0xff] }
  0xb9   :  { %4233 = vmatpush3.bf16.msra.mxu0 %v4650_v8  ;;  %v65_v20 = vunpack.c.l.bf16 %v35_v19  ;;  %v4687_v8 = vld [vmem:[%s6066_s2 + $0x6f0] sm:$0xff]  }
  0xba   :  { %4234 = vmatprep.subr.bf16.mxu0 %v4653_v10  ;;  %v4688_v10 = vld [vmem:[%s6066_s2 + $0x6b0] sm:$0xff]  }
  0xbb   :  { %4171 = vmatpush3.bf16.msra.mxu1 %v4624_v21  ;;  %v66_v21 = vunpack.c.h.bf16 %v35_v19 }
  0xbc   :  { %4172 = vmatprep.subr.bf16.mxu1 %v4627_v23  ;;  %v121_v23 = vunpack.c.l.bf16 %v91_v22  ;;  %v4695_v22 = vld [vmem:[%s6066_s2 + $0x7c0] sm:$0xff]  }
  0xbd   :  { %4235 = vmatpush3.bf16.msra.mxu0 %v4654_v12  ;;  %v159_v28 = vsub.f32 %v66_v21, %v122_v24  ;;  %v4691_v12 = vld [vmem:[%s6066_s2 + $0x6f8] sm:$0xff]  }
  0xbe   :  { %4236 = vmatprep.subr.bf16.mxu0 %v4657_v14  ;;  %v158_v30 = vsub.f32 %v65_v20, %v121_v23  ;;  %v4692_v14 = vld [vmem:[%s6066_s2 + $0x6b8] sm:$0xff]  }
  0xbf   :  { %4173 = vmatpush3.bf16.msra.mxu1 %v4628_v25  ;;  %v4663_v25 = vld [vmem:[%s6066_s2 + $0x6c0] sm:$0xff]   ;;  %v196_v36 = vand.u32 2147483647, %v159_v28 }
  0xc0   :  { %4202 = vmatprep.subr.bf16.mxu1 %v4631_v33  ;;  %v123_v33 = vunpack.c.l.bf16 %v92_v27  ;;  %v195_v37 = vand.u32 2147483647, %v158_v30  ;;  %v4694_v27 = vld [vmem:[%s6066_s2 + $0x738] sm:$0xff]   ;;  %v127_v30 = vunpack.c.l.bf16 %v94_v26 }
  0xc1   :  { %4237 = vmatpush3.bf16.msra.mxu0 %v4658_v15  ;;  %v233_v41 = vpack.c.bf16 %v196_v36, %v196_v36  ;;  %v37_v15 = vld [vmem:[%s6067_s0 + $0x68] sm:$0xff]  ;;  %v4697_v36 = vld [vmem:[%s6066_s2 + $0x840] sm:$0xff]  }
  0xc2   :  { %2980 = vmatmul.mubr.bf16.vlgmr.msra.gmra.mrb[20].mxu1 %v228_v49  ;;  %4238 = vmatprep.subr.bf16.mxu0 %v4661_v18  ;;  %v160_v40 = vsub.f32 %v67_v31, %v123_v33  ;;  %v232_v42 = vpack.c.bf16 %v195_v37, %v195_v37  ;;  %v4668_v49 = vld [vmem:[%s6066_s2 + $0x688] sm:$0xff]   ;;  %v69_v18 = vunpack.c.l.bf16 %v37_v15  ;;  %v70_v19 = vunpack.c.h.bf16 %v37_v15  ;;  %v4721_v15 = vld [vmem:[%s6066_s2 + $0x870] sm:$0xff]  }
  0xc3   :  { %4203 = vmatpush3.bf16.msra.mxu1 %v4632_v50  ;;  %3059 = vmatprep.mubr.bf16.mxu1 %v233_v41  ;;  %v4669_v50 = vld [vmem:[%s6066_s2 + $0x748] sm:$0xff]   ;;  %v128_v31 = vunpack.c.h.bf16 %v94_v26  ;;  %v4727_v26 = vld [vmem:[%s6066_s2 + $0x8c0] sm:$0xff]  }
  0xc4   :  { %4204 = vmatprep.subr.bf16.mxu1 %v4635_v54  ;;  %v197_v45 = vand.u32 2147483647, %v160_v40  ;;  %v4673_v54 = vld [vmem:[%s6066_s2 + $0x750] sm:$0xff]  }
  0xc5   :  { %4239 = vmatpush3.bf16.msra.mxu0 %v4662_v29 }
  0xc6   :  { %4268 = vmatprep.subr.bf16.mxu0 %v4665_v35  ;;  %v234_v48 = vpack.c.bf16 %v197_v45, %v197_v45 }
  0xc7   :  { %4205 = vmatpush3.bf16.msra.mxu1 %v4636_v57  ;;  %v4676_v57 = vld [vmem:[%s6066_s2 + $0x698] sm:$0xff]  }
  0xc8   :  { %4206 = vmatprep.subr.bf16.mxu1 %v4639_v59  ;;  %3100 = vmatmul.mubr.bf16.vlgmr.msra.gmra.mrb[20].mxu0 %v234_v48  ;;  %v4679_v59 = vld [vmem:[%s6066_s2 + $0x6e0] sm:$0xff]   ;;  %v4703_v48 = vld [vmem:[%s6066_s2 + $0x7d0] sm:$0xff]  }
  0xc9   :  { %4269 = vmatpush3.bf16.msra.mxu0 %v4666_v46  ;;  %v4700_v46 = vld [vmem:[%s6066_s2 + $0x788] sm:$0xff]  }
  0xca   :  { %4270 = vmatprep.subr.bf16.mxu0 %v4669_v50  ;;  %v4704_v50 = vld [vmem:[%s6066_s2 + $0x790] sm:$0xff]  }
  0xcb   :  { %4207 = vmatpush3.bf16.msra.mxu1 %v4640_v61  ;;  %v4680_v61 = vld [vmem:[%s6066_s2 + $0x6a0] sm:$0xff]  }
  0xcc   :  { %4208 = vmatprep.subr.bf16.mxu1 %v4643_v63 }
  0xcd   :  { %4271 = vmatpush3.bf16.msra.mxu0 %v4670_v52  ;;  %v4707_v52 = vld [vmem:[%s6066_s2 + $0x7d8] sm:$0xff]  }
  0xce   :  { %4272 = vmatprep.subr.bf16.mxu0 %v4673_v54 }
  0xcf   :  { %4209 = vmatpush3.bf16.msra.mxu1 %v4644_v1  ;;  %v4682_v1 = vld [vmem:[%s6066_s2 + $0x720] sm:$0xff]  }
  0xd0   :  { %4210 = vmatprep.subr.bf16.mxu1 %v4647_v3 }
  0xd1   :  { %4273 = vmatpush3.bf16.msra.mxu0 %v4674_v56 }
  0xd2   :  { %4274 = vmatprep.subr.bf16.mxu0 %v4677_v58 }
  0xd3   :  { %4211 = vmatpush3.bf16.msra.mxu1 %v4648_v5  ;;  %v4684_v5 = vld [vmem:[%s6066_s2 + $0x6a8] sm:$0xff]  }
  0xd4   :  { %4212 = vmatprep.subr.bf16.mxu1 %v4651_v7  ;;  %v4685_v7 = vld [vmem:[%s6066_s2 + $0x768] sm:$0xff]  }
  0xd5   :  { %4275 = vmatpush3.bf16.msra.mxu0 %v4678_v60  ;;  %v4711_v60 = vld [vmem:[%s6066_s2 + $0x7e0] sm:$0xff]  }
  0xd6   :  { %4276 = vmatprep.subr.bf16.mxu0 %v4681_v62  ;;  %v4710_v62 = vld [vmem:[%s6066_s2 + $0x818] sm:$0xff]  }
  0xd7   :  { %4213 = vmatpush3.bf16.msra.mxu1 %v4652_v9  ;;  %v4686_v9 = vld [vmem:[%s6066_s2 + $0x728] sm:$0xff]  }
  0xd8   :  { %4214 = vmatprep.subr.bf16.mxu1 %v4655_v11  ;;  %v4689_v11 = vld [vmem:[%s6066_s2 + $0x770] sm:$0xff]  }
  0xd9   :  { %4277 = vmatpush3.bf16.msra.mxu0 %v4682_v1  ;;  %v4713_v1 = vld [vmem:[%s6066_s2 + $0x860] sm:$0xff]  }
  0xda   :  { %4278 = vmatprep.subr.bf16.mxu0 %v4685_v7  ;;  %v4714_v7 = vld [vmem:[%s6066_s2 + $0x820] sm:$0xff]  }
  0xdb   :  { %4215 = vmatpush3.bf16.msra.mxu1 %v4656_v13  ;;  %v4690_v13 = vld [vmem:[%s6066_s2 + $0x730] sm:$0xff]  }
  0xdc   :  { %4216 = vmatprep.subr.bf16.mxu1 %v4659_v16  ;;  %v93_v16 = vld [vmem:[%s6068_s1 + $0x68] sm:$0xff] }
  0xdd   :  { %4279 = vmatpush3.bf16.msra.mxu0 %v4686_v9  ;;  %v125_v20 = vunpack.c.l.bf16 %v93_v16  ;;  %v126_v21 = vunpack.c.h.bf16 %v93_v16  ;;  %v4722_v16 = vld [vmem:[%s6066_s2 + $0x830] sm:$0xff]  }
  0xde   :  { %4280 = vmatprep.subr.bf16.mxu0 %v4689_v11  ;;  %v4717_v11 = vld [vmem:[%s6066_s2 + $0x868] sm:$0xff]  }
  0xdf   :  { %4217 = vmatpush3.bf16.msra.mxu1 %v4660_v17  ;;  %v4693_v17 = vld [vmem:[%s6066_s2 + $0x778] sm:$0xff]   ;;  %v163_v23 = vsub.f32 %v70_v19, %v126_v21  ;;  %v162_v24 = vsub.f32 %v69_v18, %v125_v20 }
  0xe0   :  { %4246 = vmatprep.subr.bf16.mxu1 %v4663_v25  ;;  %v38_v25 = vld [vmem:[%s6067_s0 + $0x70] sm:$0xff]  ;;  %v4724_v18 = vld [vmem:[%s6066_s2 + $0x7b8] sm:$0xff]  }
  0xe1   :  { %4281 = vmatpush3.bf16.msra.mxu0 %v4690_v13  ;;  %v71_v28 = vunpack.c.l.bf16 %v38_v25  ;;  %v72_v29 = vunpack.c.h.bf16 %v38_v25  ;;  %v200_v32 = vand.u32 2147483647, %v163_v23  ;;  %v199_v33 = vand.u32 2147483647, %v162_v24  ;;  %v4719_v13 = vld [vmem:[%s6066_s2 + $0x7f0] sm:$0xff]   ;;  %v4725_v19 = vld [vmem:[%s6066_s2 + $0x878] sm:$0xff]  }
  0xe2   :  { %3060 = vmatmul.mubr.bf16.vlgmr.msra.gmra.mrb[24].mxu1 %v232_v42  ;;  %4282 = vmatprep.subr.bf16.mxu0 %v4693_v17  ;;  %v4698_v42 = vld [vmem:[%s6066_s2 + $0x800] sm:$0xff]   ;;  %v4723_v17 = vld [vmem:[%s6066_s2 + $0x7f8] sm:$0xff]  }
  0xe3   :  { %4247 = vmatpush3.bf16.msra.mxu1 %v4664_v39  ;;  %v165_v34 = vsub.f32 %v72_v29, %v128_v31  ;;  %v164_v35 = vsub.f32 %v71_v28, %v127_v30  ;;  %v237_v37 = vpack.c.bf16 %v200_v32, %v200_v32  ;;  %v236_v38 = vpack.c.bf16 %v199_v33, %v199_v33  ;;  %v4696_v39 = vld [vmem:[%s6066_s2 + $0x780] sm:$0xff]   ;;  %v39_v20 = vld [vmem:[%s6067_s0 + $0x78] sm:$0xff] }
  0xe4   :  { %4248 = vmatprep.subr.bf16.mxu1 %v4667_v43  ;;  %v4699_v43 = vld [vmem:[%s6066_s2 + $0x7c8] sm:$0xff]   ;;  %v73_v21 = vunpack.c.l.bf16 %v39_v20  ;;  %v95_v23 = vld [vmem:[%s6068_s1 + $0x78] sm:$0xff]  ;;  %v96_v28 = vld [vmem:[%s6068_s1 + $0x80] sm:$0xff] }
  0xe5   :  { %4283 = vmatpush3.bf16.msra.mxu0 %v4694_v27  ;;  %v202_v40 = vand.u32 2147483647, %v165_v34  ;;  %v201_v41 = vand.u32 2147483647, %v164_v35  ;;  %3139 = vmatprep.mubr.bf16.mxu1 %v237_v37  ;;  %v129_v24 = vunpack.c.l.bf16 %v95_v23  ;;  %v130_v25 = vunpack.c.h.bf16 %v95_v23  ;;  %v40_v27 = vld [vmem:[%s6067_s0 + $0x80] sm:$0xff]  ;;  %v4726_v30 = vld [vmem:[%s6066_s2 + $0x838] sm:$0xff]  }
  0xe6   :  { %4312 = vmatprep.subr.bf16.mxu0 %v4697_v36  ;;  %v75_v32 = vunpack.c.l.bf16 %v40_v27  ;;  %v76_v33 = vunpack.c.h.bf16 %v40_v27  ;;  %v131_v34 = vunpack.c.l.bf16 %v96_v28  ;;  %v132_v35 = vunpack.c.h.bf16 %v96_v28  ;;  %v4742_v27 = vld [vmem:[%s6066_s2 + $0x8b0] sm:$0xff]  }
  0xe7   :  { %4249 = vmatpush3.bf16.msra.mxu1 %v4668_v49  ;;  %v239_v44 = vpack.c.bf16 %v202_v40, %v202_v40  ;;  %v238_v45 = vpack.c.bf16 %v201_v41, %v201_v41  ;;  %v4702_v49 = vld [vmem:[%s6066_s2 + $0x808] sm:$0xff]   ;;  %v166_v31 = vsub.f32 %v73_v21, %v129_v24 }
  0xe8   :  { %4250 = vmatprep.subr.bf16.mxu1 %v4671_v51  ;;  %v4705_v51 = vld [vmem:[%s6066_s2 + $0x850] sm:$0xff]   ;;  %v168_v40 = vsub.f32 %v75_v32, %v131_v34 }
  0xe9   :  { %3179 = vmatprep.mubr.bf16.mxu0 %v239_v44  ;;  %v203_v37 = vand.u32 2147483647, %v166_v31  ;;  %v4745_v31 = vld [vmem:[%s6066_s2 + $0x8b8] sm:$0xff]  }
  0xea   :  { %3180 = vmatmul.mubr.bf16.vlgmr.msra.gmra.mrb[24].mxu0 %v238_v45  ;;  %v205_v45 = vand.u32 2147483647, %v168_v40 }
  0xeb   :  { %4251 = vmatpush3.bf16.msra.mxu1 %v4672_v53  ;;  %4313 = vmatpush3.bf16.msra.mxu0 %v4698_v42  ;;  %v4706_v53 = vld [vmem:[%s6066_s2 + $0x810] sm:$0xff]   ;;  %v240_v42 = vpack.c.bf16 %v203_v37, %v203_v37 }
  0xec   :  { %4252 = vmatprep.subr.bf16.mxu1 %v4675_v55  ;;  %4314 = vmatprep.subr.bf16.mxu0 %v4701_v47  ;;  %v4708_v55 = vld [vmem:[%s6066_s2 + $0x798] sm:$0xff]  }
  0xef   :  { %4253 = vmatpush3.bf16.msra.mxu1 %v4676_v57  ;;  %4315 = vmatpush3.bf16.msra.mxu0 %v4702_v49  ;;  %v4709_v57 = vld [vmem:[%s6066_s2 + $0x858] sm:$0xff]   ;;  %v4730_v49 = vld [vmem:[%s6066_s2 + $0x888] sm:$0xff]  }
  0xf0   :  { %4254 = vmatprep.subr.bf16.mxu1 %v4679_v59  ;;  %4316 = vmatprep.subr.bf16.mxu0 %v4705_v51  ;;  %v4737_v51 = vld [vmem:[%s6066_s2 + $0x900] sm:$0xff]  }
  0xf3   :  { %4255 = vmatpush3.bf16.msra.mxu1 %v4680_v61  ;;  %4317 = vmatpush3.bf16.msra.mxu0 %v4706_v53  ;;  %v4733_v53 = vld [vmem:[%s6066_s2 + $0x8d8] sm:$0xff]  }
  0xf4   :  { %4256 = vmatprep.subr.bf16.mxu1 %v4683_v0  ;;  %4318 = vmatprep.subr.bf16.mxu0 %v4709_v57 }
  0xf5   :  { %v3976_v63 = vpop.f32.mrb[0].mxu1 }
  0xf6   :  { %v3977_v2 = vpop.f32.mrb[1].mxu1 }
  0xf7   :  { %v5555_v3 = vadd.f32 %v3977_v2, %v3976_v63  ;;  %v3979_v4 = vpop.f32.mrb[2].mxu1  ;;  %4257 = vmatpush3.bf16.msra.mxu1 %v4684_v5  ;;  %v4712_v63 = vld [vmem:[%s6066_s2 + $0x7a0] sm:$0xff]   ;;  %v4715_v5 = vld [vmem:[%s6066_s2 + $0x7e8] sm:$0xff]   ;;  %4319 = vmatpush3.bf16.msra.mxu0 %v4710_v62  ;;  %v4743_v62 = vld [vmem:[%s6066_s2 + $0x910] sm:$0xff]  }
  0xf8   :  { %v3980_v6 = vpop.f32.mrb[3].mxu1  ;;  %4258 = vmatprep.subr.bf16.mxu1 %v4687_v8  ;;  %4320 = vmatprep.subr.bf16.mxu0 %v4713_v1  ;;  %v4736_v1 = vld [vmem:[%s6066_s2 + $0x8a0] sm:$0xff]  }
  0xfb   :  { %4259 = vmatpush3.bf16.msra.mxu1 %v4688_v10  ;;  %v4020_v54 = vpop.f32.mrb[0].mxu0  ;;  %v4716_v10 = vld [vmem:[%s6066_s2 + $0x7a8] sm:$0xff]   ;;  %4321 = vmatpush3.bf16.msra.mxu0 %v4714_v7 }
  0xfc   :  { %4260 = vmatprep.subr.bf16.mxu1 %v4691_v12  ;;  %v4021_v56 = vpop.f32.mrb[1].mxu0  ;;  %4322 = vmatprep.subr.bf16.mxu0 %v4717_v11 }
  0xfd   :  { %v4022_v58 = vadd.f32 %v4021_v56, %v4020_v54  ;;  %v4023_v59 = vpop.f32.mrb[2].mxu0  ;;  %v4734_v56 = vld [vmem:[%s6066_s2 + $0x898] sm:$0xff]  }
  0xfe   :  { %v4024_v61 = vpop.f32.mrb[3].mxu0 }
  0xff   :  { %4261 = vmatpush3.bf16.msra.mxu1 %v4692_v14  ;;  %v4720_v14 = vld [vmem:[%s6066_s2 + $0x7b0] sm:$0xff]  }
 0x100   :  { %4290 = vmatprep.subr.bf16.mxu1 %v4695_v22  ;;  %v74_v22 = vunpack.c.h.bf16 %v39_v20  ;;  %v4739_v20 = vld [vmem:[%s6066_s2 + $0x8a8] sm:$0xff]  }
 0x102   :  { %3140 = vmatmul.mubr.bf16.vlgmr.msra.gmra.mrb[28].mxu1 %v236_v38  ;;  %v167_v29 = vsub.f32 %v74_v22, %v130_v25  ;;  %v169_v38 = vsub.f32 %v76_v33, %v132_v35  ;;  %v4741_v22 = vld [vmem:[%s6066_s2 + $0x8f0] sm:$0xff]  }
 0x103   :  { %4291 = vmatpush3.bf16.msra.mxu1 %v4696_v39  ;;  %v4728_v39 = vld [vmem:[%s6066_s2 + $0x880] sm:$0xff]  }
 0x104   :  { %4292 = vmatprep.subr.bf16.mxu1 %v4699_v43  ;;  %v204_v36 = vand.u32 2147483647, %v167_v29  ;;  %v4729_v43 = vld [vmem:[%s6066_s2 + $0x8c8] sm:$0xff]   ;;  %v206_v44 = vand.u32 2147483647, %v169_v38  ;;  %v4744_v29 = vld [vmem:[%s6066_s2 + $0x8f8] sm:$0xff]  }
 0x106   :  { %v241_v41 = vpack.c.bf16 %v204_v36, %v204_v36  ;;  %v243_v47 = vpack.c.bf16 %v206_v44, %v206_v44 }
 0x107   :  { %4293 = vmatpush3.bf16.msra.mxu1 %v4700_v46  ;;  %v4753_v46 = vmov 0.0  }
 0x108   :  { %4294 = vmatprep.subr.bf16.mxu1 %v4703_v48  ;;  %3219 = vmatprep.mubr.bf16.mxu1 %v241_v41  ;;  %v242_v48 = vpack.c.bf16 %v205_v45, %v205_v45 }
 0x109   :  { %3259 = vmatprep.mubr.bf16.mxu0 %v243_v47 }
 0x10b   :  { %4295 = vmatpush3.bf16.msra.mxu1 %v4704_v50  ;;  %v4731_v50 = vld [vmem:[%s6066_s2 + $0x8d0] sm:$0xff]  }
 0x10c   :  { %4296 = vmatprep.subr.bf16.mxu1 %v4707_v52  ;;  %v4732_v52 = vld [vmem:[%s6066_s2 + $0x890] sm:$0xff]  }
 0x10f   :  { %4297 = vmatpush3.bf16.msra.mxu1 %v4708_v55  ;;  %v4740_v55 = vld [vmem:[%s6066_s2 + $0x908] sm:$0xff]  }
 0x110   :  { %4298 = vmatprep.subr.bf16.mxu1 %v4711_v60 }
 0x113   :  { %4299 = vmatpush3.bf16.msra.mxu1 %v4712_v63 }
 0x114   :  { %4300 = vmatprep.subr.bf16.mxu1 %v4715_v5  ;;  %v97_v5 = vld [vmem:[%s6068_s1 + $0x88] sm:$0xff] }
 0x115   :  { %v3998_v0 = vpop.f32.mrb[4].mxu1  ;;  %v134_v11 = vunpack.c.h.bf16 %v97_v5 }
 0x116   :  { %v3999_v2 = vpop.f32.mrb[5].mxu1 }
 0x117   :  { %v4000_v4 = vadd.f32 %v3999_v2, %v3998_v0  ;;  %v4001_v6 = vpop.f32.mrb[6].mxu1  ;;  %4301 = vmatpush3.bf16.msra.mxu1 %v4716_v10 }
 0x118   :  { %v4002_v8 = vpop.f32.mrb[7].mxu1  ;;  %4302 = vmatprep.subr.bf16.mxu1 %v4719_v13  ;;  %v4746_v13 = vld [vmem:[%s6066_s2 + $0x918] sm:$0xff]  }
 0x119   :  { %v2662_v9 = vadd.f32 %v4000_v4, %v5555_v3  ;;  %v4718_v3 = vld [vmem:[%s6066_s2 + $0x828] sm:$0xff]  }
 0x11a   :  { %4323 = vmatpush3.bf16.msra.mxu0 %v4718_v3  ;;  %v41_v4 = vld [vmem:[%s6067_s0 + $0x88] sm:$0xff]  ;;  %v42_v3 = vld [vmem:[%s6067_s0 + $0x90] sm:$0xf] }
 0x11b   :  { %v5672_v12 = vadd.f32 %v4022_v58, %v2662_v9  ;;  %4303 = vmatpush3.bf16.msra.mxu1 %v4720_v14  ;;  %4324 = vmatprep.subr.bf16.mxu0 %v4721_v15  ;;  %v4064_v54 = vpop.f32.mrb[4].mxu0  ;;  %v4735_v58 = vld [vmem:[%s6066_s2 + $0x8e0] sm:$0xff]   ;;  %v4738_v8 = vld [vmem:[%s6066_s2 + $0x8e8] sm:$0xff]   ;;  %v78_v9 = vunpack.c.h.bf16 %v41_v4  ;;  %v79_v15 = vunpack.c.l.bf16 %v42_v3 }
 0x11c   :  { %4304 = vmatprep.subr.bf16.mxu1 %v4723_v17  ;;  %v4065_v57 = vpop.f32.mrb[5].mxu0  ;;  %v77_v17 = vunpack.c.l.bf16 %v41_v4  ;;  %v3355_v4 = vld [vmem:[%s6069_s3 + $0x30] sm:$0xff] }
 0x11d   :  { %v4066_v60 = vadd.f32 %v4065_v57, %v4064_v54  ;;  %v4067_v6 = vpop.f32.mrb[6].mxu0  ;;  %v3350_v57 = vld [vmem:[%s6069_s3 + $0x8] sm:$0xff] }
 0x11e   :  { %4325 = vmatpush3.bf16.msra.mxu0 %v4722_v16  ;;  %v4068_v10 = vpop.f32.mrb[7].mxu0  ;;  %v3360_v6 = vld [vmem:[%s6069_s3 + $0x58] sm:$0xff] }
 0x11f   :  { %4305 = vmatpush3.bf16.msra.mxu1 %v4724_v18  ;;  %4326 = vmatprep.subr.bf16.mxu0 %v4725_v19  ;;  %v133_v18 = vunpack.c.l.bf16 %v97_v5  ;;  %v171_v19 = vsub.f32 %v78_v9, %v134_v11  ;;  %v3358_v5 = vld [vmem:[%s6069_s3 + $0x48] sm:$0xff]  ;;  %v3357_v9 = vld [vmem:[%s6069_s3 + $0x40] sm:$0xff]  ;;  %v3359_v10 = vld [vmem:[%s6069_s3 + $0x50] sm:$0xff] }
 0x120   :  { %4334 = vmatprep.subr.bf16.mxu1 %v4727_v26  ;;  %v4383_v11 = vpack.c.bf16 %v3359_v10, %v3357_v9 }
 0x121   :  { %v208_v23 = vand.u32 2147483647, %v171_v19  ;;  %v170_v26 = vsub.f32 %v77_v17, %v133_v18 }
 0x122   :  { %4327 = vmatpush3.bf16.msra.mxu0 %v4726_v30  ;;  %3220 = vmatmul.mubr.bf16.vlgmr.msra.gmra.mrb[32].mxu1 %v240_v42 }
 0x123   :  { %4361 = vmatprep.subr.bf16.mxu0 %v4753_v46  ;;  %4335 = vmatpush3.bf16.msra.mxu1 %v4728_v39  ;;  %v245_v25 = vpack.c.bf16 %v208_v23, %v208_v23  ;;  %v207_v30 = vand.u32 2147483647, %v170_v26  ;;  %v3362_v23 = vld [vmem:[%s6069_s3 + $0x68] sm:$0xff]  ;;  %v3361_v26 = vld [vmem:[%s6069_s3 + $0x60] sm:$0xff] }
 0x124   :  { %4336 = vmatprep.subr.bf16.mxu1 %v4729_v43 }
 0x125   :  { %3260 = vmatmul.mubr.bf16.vlgmr.msra.gmra.mrb[28].mxu0 %v242_v48  ;;  %3299 = vmatprep.mubr.bf16.mxu1 %v245_v25  ;;  %v244_v32 = vpack.c.bf16 %v207_v30, %v207_v30  ;;  %v3365_v30 = vld [vmem:[%s6069_s3 + $0x80] sm:$0xff] }
 0x126   :  { %4369 = vmatprep.mubr.msk.bf16.mxu0 %vm4754_vm0, %v4753_v46  ;;  %4362 = vmatpush3.bf16.msra.mxu0 %v4737_v51 }
 0x127   :  { %4337 = vmatpush3.bf16.msra.mxu1 %v4730_v49  ;;  %4363 = vmatprep.subr.bf16.mxu0 %v4753_v46 }
 0x128   :  { %4338 = vmatprep.subr.bf16.mxu1 %v4731_v50 }
 0x12a   :  { %4364 = vmatpush3.bf16.msra.mxu0 %v4740_v55 }
 0x12b   :  { %4339 = vmatpush3.bf16.msra.mxu1 %v4732_v52  ;;  %4365 = vmatprep.subr.bf16.mxu0 %v4753_v46 }
 0x12c   :  { %4340 = vmatprep.subr.bf16.mxu1 %v4733_v53 }
 0x12e   :  { %4366 = vmatpush3.bf16.msra.mxu0 %v4743_v62  ;;  %v3354_v62 = vld [vmem:[%s6069_s3 + $0x28] sm:$0xff] }
 0x12f   :  { %4341 = vmatpush3.bf16.msra.mxu1 %v4734_v56  ;;  %4367 = vmatprep.subr.bf16.mxu0 %v4753_v46 }
 0x130   :  { %4342 = vmatprep.subr.bf16.mxu1 %v4735_v58  ;;  %v3352_v58 = vld [vmem:[%s6069_s3 + $0x18] sm:$0xff] }
 0x132   :  { %4368 = vmatpush3.bf16.msra.mxu0 %v4746_v13 }
 0x133   :  { %4343 = vmatpush3.bf16.msra.mxu1 %v4736_v1 }
 0x134   :  { %4344 = vmatprep.subr.bf16.mxu1 %v4738_v8  ;;  %v4381_v8 = vpack.c.bf16 %v3360_v6, %v3358_v5  ;;  %v3487_v5 = vld [vmem:[%s6070_s4 + $0xd8] sm:$0xff] }
 0x135   :  { %v4042_v59 = vpop.f32.mrb[8].mxu1 }
 0x136   :  { %v4043_v61 = vpop.f32.mrb[9].mxu1 }
 0x137   :  { %v4044_v63 = vadd.f32 %v4043_v61, %v4042_v59  ;;  %v4045_v0 = vpop.f32.mrb[10].mxu1  ;;  %4345 = vmatpush3.bf16.msra.mxu1 %v4739_v20  ;;  %v3349_v59 = vld [vmem:[%s6069_s3] sm:$0xff]  ;;  %v3351_v61 = vld [vmem:[%s6069_s3 + $0x10] sm:$0xff] }
 0x138   :  { %v4046_v2 = vpop.f32.mrb[11].mxu1  ;;  %4346 = vmatprep.subr.bf16.mxu1 %v4741_v22  ;;  %v4375_v0 = vpack.c.bf16 %v3351_v61, %v3349_v59  ;;  %v3478_v59 = vld [vmem:[%s6070_s4 + $0x90] sm:$0xff]  ;;  %v3483_v61 = vld [vmem:[%s6070_s4 + $0xb8] sm:$0xff] }
 0x139   :  { %v2742_v7 = vadd.f32 %v4044_v63, %v5672_v12  ;;  %v98_v12 = vld [vmem:[%s6068_s1 + $0x90] sm:$0xf]  ;;  %v3356_v63 = vld [vmem:[%s6069_s3 + $0x38] sm:$0xff]  ;;  %v3353_v2 = vld [vmem:[%s6069_s3 + $0x20] sm:$0xff] }
 0x13a   :  { %v135_v16 = vunpack.c.l.bf16 %v98_v12  ;;  %v4377_v1 = vpack.c.bf16 %v3356_v63, %v3354_v62 }
 0x13b   :  { %v2782_v14 = vadd.f32 %v4066_v60, %v2742_v7  ;;  %4347 = vmatpush3.bf16.msra.mxu1 %v4742_v27  ;;  %v4108_v34 = vpop.f32.mrb[8].mxu0  ;;  %v4373_v60 = vpack.c.bf16 %v3352_v58, %v3350_v57  ;;  %v4379_v7 = vpack.c.bf16 %v3355_v4, %v3353_v2  ;;  %v3363_v27 = vld [vmem:[%s6069_s3 + $0x70] sm:$0xff]  ;;  %v3476_v58 = vld [vmem:[%s6070_s4 + $0x80] sm:$0xff]  ;;  %v3485_v4 = vld [vmem:[%s6070_s4 + $0xc8] sm:$0xff] }
 0x13c   :  { %v172_v21 = vsub.f32 %v79_v15, %v135_v16  ;;  %4348 = vmatprep.subr.bf16.mxu1 %v4744_v29  ;;  %v4109_v36 = vpop.f32.mrb[9].mxu0  ;;  %v3366_v29 = vld [vmem:[%s6069_s3 + $0x88] sm:$0xff]  ;;  %v4407_v62 = vpack.c.bf16 %v3478_v59, %v3476_v58 }
 0x13d   :  { %v4110_v39 = vadd.f32 %v4109_v36, %v4108_v34  ;;  %v4111_v40 = vpop.f32.mrb[10].mxu0  ;;  %v3465_v36 = vld [vmem:[%s6070_s4 + $0x28] sm:$0xff] }
 0x13e   :  { %v209_v24 = vand.u32 2147483647, %v172_v21  ;;  %v4112_v42 = vpop.f32.mrb[11].mxu0  ;;  %v3464_v40 = vld [vmem:[%s6070_s4 + $0x20] sm:$0xff] }
 0x13f   :  { %4349 = vmatpush3.bf16.msra.mxu1 %v4745_v31  ;;  %v3461_v31 = vld [vmem:[%s6070_s4 + $0x8] sm:$0xff] }
 0x140   :  { %v246_v28 = vpack.c.bf16 %v209_v24, %v209_v24  ;;  %4374 = vmatprep.subr.bf16.mxu1 %v4373_v60  ;;  %v3364_v24 = vld [vmem:[%s6069_s3 + $0x78] sm:$0xff]  ;;  %v3469_v42 = vld [vmem:[%s6070_s4 + $0x48] sm:$0xff] }
 0x141   :  { %v4385_v25 = vpack.c.bf16 %v3364_v24, %v3362_v23  ;;  %v3481_v60 = vld [vmem:[%s6070_s4 + $0xa8] sm:$0xff] }
 0x142   :  { %4370 = vmatmul.mubr.msk.bf16.vlgmr.msra.gmra.mrb[32].mxu0 %vm2583_vm1, %v246_v28  ;;  %3300 = vmatmul.mubr.bf16.vlgmr.msra.gmra.mrb[36].mxu1 %v244_v32  ;;  %v4387_v28 = vpack.c.bf16 %v3363_v27, %v3361_v26  ;;  %v3463_v32 = vld [vmem:[%s6070_s4 + $0x18] sm:$0xff]  ;;  %v4409_v63 = vpack.c.bf16 %v3483_v61, %v3481_v60  ;;  %v3493_v26 = vld [vmem:[%s6070_s4 + $0x108] sm:$0xff] }
 0x143   :  { %3443 = vmatprep.mubr.f32.mxu1 %v4753_v46  ;;  %4376 = vmatpush1.bf16.msra.mxu1 %v4375_v0  ;;  %v4389_v34 = vpack.c.bf16 %v3463_v32, %v3461_v31  ;;  %v3480_v0 = vld [vmem:[%s6070_s4 + $0xa0] sm:$0xff]  ;;  %v3495_v27 = vld [vmem:[%s6070_s4 + $0x118] sm:$0xff]  ;;  %v3494_v31 = vld [vmem:[%s6070_s4 + $0x110] sm:$0xff] }
 0x144   :  { %4378 = vmatprep.subr.bf16.mxu1 %v4377_v1  ;;  %v3482_v1 = vld [vmem:[%s6070_s4 + $0xb0] sm:$0xff]  ;;  %v3497_v32 = vld [vmem:[%s6070_s4 + $0x128] sm:$0xff] }
 0x145   :  { %4390 = vmatprep.subr.bf16.mxu0 %v4389_v34  ;;  %v4411_v9 = vpack.c.bf16 %v3482_v1, %v3480_v0 }
 0x147   :  { %4380 = vmatpush1.bf16.msra.mxu1 %v4379_v7 }
 0x148   :  { %4382 = vmatprep.subr.bf16.mxu1 %v4381_v8 }
 0x14b   :  { %4384 = vmatpush1.bf16.msra.mxu1 %v4383_v11 }
 0x14c   :  { %4386 = vmatprep.subr.bf16.mxu1 %v4385_v25  ;;  %v3490_v25 = vld [vmem:[%s6070_s4 + $0xf0] sm:$0xff] }
 0x14f   :  { %4388 = vmatpush1.bf16.msra.mxu1 %v4387_v28 }
 0x150   :  { %3395 = vmatprep.subr.mxu1 %v3366_v29  ;;  %v4421_v29 = vpack.c.bf16 %v3495_v27, %v3493_v26  ;;  %v3510_v26 = vld [vmem:[%s6070_s4 + $0x190] sm:$0xff] }
 0x153   :  { %3396 = vmatpush1.msra.mxu1 %v3365_v30  ;;  %v3492_v30 = vld [vmem:[%s6070_s4 + $0x100] sm:$0xff] }
 0x154   :  { %v4423_v34 = vpack.c.bf16 %v3494_v31, %v3492_v30  ;;  %v3512_v31 = vld [vmem:[%s6070_s4 + $0x1a0] sm:$0xff] }
 0x155   :  { %v4086_v33 = vpop.f32.mrb[12].mxu1 }
 0x156   :  { %v4087_v35 = vpop.f32.mrb[13].mxu1 }
 0x157   :  { %v4088_v37 = vadd.f32 %v4087_v35, %v4086_v33  ;;  %v4089_v38 = vpop.f32.mrb[14].mxu1  ;;  %v3460_v33 = vld [vmem:[%s6070_s4] sm:$0xff]  ;;  %v3462_v35 = vld [vmem:[%s6070_s4 + $0x10] sm:$0xff] }
 0x158   :  { %v4090_v41 = vpop.f32.mrb[15].mxu1  ;;  %v4391_v38 = vpack.c.bf16 %v3462_v35, %v3460_v33  ;;  %v3499_v33 = vld [vmem:[%s6070_s4 + $0x138] sm:$0xff] }
 0x159   :  { %v2822_v43 = vadd.f32 %v4088_v37, %v2782_v14  ;;  %v3467_v37 = vld [vmem:[%s6070_s4 + $0x38] sm:$0xff]  ;;  %v3466_v41 = vld [vmem:[%s6070_s4 + $0x30] sm:$0xff]  ;;  %v4425_v35 = vpack.c.bf16 %v3499_v33, %v3497_v32 }
 0x15a   :  { %4392 = vmatpush1.bf16.msra.mxu0 %v4391_v38  ;;  %v3501_v38 = vld [vmem:[%s6070_s4 + $0x148] sm:$0xff]  ;;  %v3514_v32 = vld [vmem:[%s6070_s4 + $0x1b0] sm:$0xff] }
 0x15b   :  { %v2862_v44 = vadd.f32 %v4110_v39, %v2822_v43  ;;  %v4152_v50 = vpop.f32.mrb[12].mxu0  ;;  %v4393_v39 = vpack.c.bf16 %v3467_v37, %v3465_v36  ;;  %v3471_v43 = vld [vmem:[%s6070_s4 + $0x58] sm:$0xff]  ;;  %v3496_v36 = vld [vmem:[%s6070_s4 + $0x120] sm:$0xff]  ;;  %v3498_v37 = vld [vmem:[%s6070_s4 + $0x130] sm:$0xff]  ;;  %v4443_v33 = vpack.c.bf16 %v3514_v32, %v3512_v31 }
 0x15c   :  { %v4153_v46 = vpop.f32.mrb[13].mxu0 }
 0x15d   :  { %v4154_v53 = vadd.f32 %v4153_v46, %v4152_v50  ;;  %v4155_v54 = vpop.f32.mrb[14].mxu0  ;;  %4394 = vmatprep.subr.bf16.mxu0 %v4393_v39  ;;  %v3475_v50 = vld [vmem:[%s6070_s4 + $0x78] sm:$0xff]  ;;  %v3472_v46 = vld [vmem:[%s6070_s4 + $0x60] sm:$0xff] }
 0x15e   :  { %v4156_v55 = vpop.f32.mrb[15].mxu0  ;;  %v3477_v54 = vld [vmem:[%s6070_s4 + $0x88] sm:$0xff]  ;;  %v3503_v39 = vld [vmem:[%s6070_s4 + $0x158] sm:$0xff] }
 0x15f   :  { %v3479_v55 = vld [vmem:[%s6070_s4 + $0x98] sm:$0xff] }
 0x160   :  { %v4405_v57 = vpack.c.bf16 %v3479_v55, %v3477_v54 }
 0x175   :  { %v4130_v45 = vpop.f32.mrb[16].mxu1 }
 0x176   :  { %v4131_v47 = vpop.f32.mrb[17].mxu1 }
 0x177   :  { %v4132_v48 = vadd.f32 %v4131_v47, %v4130_v45  ;;  %v4133_v49 = vpop.f32.mrb[18].mxu1  ;;  %v4397_v45 = vpack.c.bf16 %v3471_v43, %v3469_v42  ;;  %v3468_v47 = vld [vmem:[%s6070_s4 + $0x40] sm:$0xff]  ;;  %v3502_v43 = vld [vmem:[%s6070_s4 + $0x150] sm:$0xff] }
 0x178   :  { %v4134_v51 = vpop.f32.mrb[19].mxu1  ;;  %v3473_v49 = vld [vmem:[%s6070_s4 + $0x68] sm:$0xff]  ;;  %v3500_v42 = vld [vmem:[%s6070_s4 + $0x140] sm:$0xff] }
 0x179   :  { %v2902_v52 = vadd.f32 %v4132_v48, %v2862_v44  ;;  %v4395_v44 = vpack.c.bf16 %v3466_v41, %v3464_v40  ;;  %v3470_v48 = vld [vmem:[%s6070_s4 + $0x50] sm:$0xff]  ;;  %v4427_v40 = vpack.c.bf16 %v3498_v37, %v3496_v36  ;;  %v4429_v41 = vpack.c.bf16 %v3503_v39, %v3501_v38  ;;  %v3516_v37 = vld [vmem:[%s6070_s4 + $0x1c0] sm:$0xff] }
 0x17a   :  { %v4399_v51 = vpack.c.bf16 %v3470_v48, %v3468_v47  ;;  %v3518_v38 = vld [vmem:[%s6070_s4 + $0x1d0] sm:$0xff] }
 0x17b   :  { %v2942_v56 = vadd.f32 %v4154_v53, %v2902_v52  ;;  %v4196_v15 = vpop.f32.mrb[16].mxu0  ;;  %4396 = vmatpush1.bf16.msra.mxu0 %v4395_v44  ;;  %v4401_v52 = vpack.c.bf16 %v3475_v50, %v3473_v49  ;;  %v3474_v53 = vld [vmem:[%s6070_s4 + $0x70] sm:$0xff]  ;;  %v4431_v44 = vpack.c.bf16 %v3502_v43, %v3500_v42  ;;  %v4447_v39 = vpack.c.bf16 %v3518_v38, %v3516_v37  ;;  %v3520_v43 = vld [vmem:[%s6070_s4 + $0x1e0] sm:$0xff] }
 0x17c   :  { %v4197_v18 = vpop.f32.mrb[17].mxu0  ;;  %4398 = vmatprep.subr.bf16.mxu0 %v4397_v45 }
 0x17d   :  { %v4198_v19 = vadd.f32 %v4197_v18, %v4196_v15  ;;  %v4199_v20 = vpop.f32.mrb[18].mxu0 }
 0x17e   :  { %v4200_v21 = vpop.f32.mrb[19].mxu0 }
 0x17f   :  { %4400 = vmatpush1.bf16.msra.mxu0 %v4399_v51 }
 0x180   :  { %4402 = vmatprep.subr.bf16.mxu0 %v4401_v52 }
 0x195   :  { %v4174_v13 = vpop.f32.mrb[20].mxu1 }
 0x196   :  { %v4175_v3 = vpop.f32.mrb[21].mxu1 }
 0x197   :  { %v4176_v12 = vadd.f32 %v4175_v3, %v4174_v13  ;;  %v4177_v14 = vpop.f32.mrb[22].mxu1  ;;  %v4413_v13 = vpack.c.bf16 %v3487_v5, %v3485_v4  ;;  %v3484_v3 = vld [vmem:[%s6070_s4 + $0xc0] sm:$0xff] }
 0x198   :  { %v4178_v16 = vpop.f32.mrb[23].mxu1 }
 0x199   :  { %v2982_v17 = vadd.f32 %v4176_v12, %v2942_v56  ;;  %v4403_v56 = vpack.c.bf16 %v3474_v53, %v3472_v46  ;;  %v3486_v12 = vld [vmem:[%s6070_s4 + $0xd0] sm:$0xff]  ;;  %v3489_v16 = vld [vmem:[%s6070_s4 + $0xe8] sm:$0xff] }
 0x19a   :  { %v4415_v21 = vpack.c.bf16 %v3486_v12, %v3484_v3 }
 0x19b   :  { %v5828_v22 = vadd.f32 %v4198_v19, %v2982_v17  ;;  %4404 = vmatpush1.bf16.msra.mxu0 %v4403_v56  ;;  %v4240_v10 = vpop.f32.mrb[20].mxu0  ;;  %v3491_v17 = vld [vmem:[%s6070_s4 + $0xf8] sm:$0xff] }
 0x19c   :  { %4406 = vmatprep.subr.bf16.mxu0 %v4405_v57  ;;  %v4241_v15 = vpop.f32.mrb[21].mxu0  ;;  %v4417_v24 = vpack.c.bf16 %v3491_v17, %v3489_v16  ;;  %v3505_v16 = vld [vmem:[%s6070_s4 + $0x168] sm:$0xff]  ;;  %v3507_v17 = vld [vmem:[%s6070_s4 + $0x178] sm:$0xff] }
 0x19d   :  { %v4242_v18 = vadd.f32 %v4241_v15, %v4240_v10  ;;  %v4243_v19 = vpop.f32.mrb[22].mxu0 }
 0x19e   :  { %v4244_v20 = vpop.f32.mrb[23].mxu0  ;;  %v3504_v19 = vld [vmem:[%s6070_s4 + $0x160] sm:$0xff] }
 0x19f   :  { %4408 = vmatpush1.bf16.msra.mxu0 %v4407_v62  ;;  %v3506_v20 = vld [vmem:[%s6070_s4 + $0x170] sm:$0xff] }
 0x1a0   :  { %4410 = vmatprep.subr.bf16.mxu0 %v4409_v63 }
 0x1a3   :  { %4412 = vmatpush1.bf16.msra.mxu0 %v4411_v9 }
 0x1a4   :  { %4414 = vmatprep.subr.bf16.mxu0 %v4413_v13 }
 0x1a7   :  { %4416 = vmatpush1.bf16.msra.mxu0 %v4415_v21  ;;  %v4435_v21 = vpack.c.bf16 %v3506_v20, %v3504_v19 }
 0x1a8   :  { %4418 = vmatprep.subr.bf16.mxu0 %v4417_v24  ;;  %v3511_v24 = vld [vmem:[%s6070_s4 + $0x198] sm:$0xff] }
 0x1b5   :  { %v4218_v2 = vpop.f32.mrb[24].mxu1 }
 0x1b6   :  { %v4219_v6 = vpop.f32.mrb[25].mxu1 }
 0x1b7   :  { %v4220_v7 = vadd.f32 %v4219_v6, %v4218_v2  ;;  %v4221_v8 = vpop.f32.mrb[26].mxu1 }
 0x1b8   :  { %v4222_v11 = vpop.f32.mrb[27].mxu1 }
 0x1b9   :  { %v3062_v14 = vadd.f32 %v4220_v7, %v5828_v22  ;;  %v3488_v22 = vld [vmem:[%s6070_s4 + $0xe0] sm:$0xff] }
 0x1ba   :  { %v4419_v28 = vpack.c.bf16 %v3490_v25, %v3488_v22  ;;  %v3508_v25 = vld [vmem:[%s6070_s4 + $0x180] sm:$0xff] }
 0x1bb   :  { %v3102_v23 = vadd.f32 %v4242_v18, %v3062_v14  ;;  %v4433_v18 = vpack.c.bf16 %v3507_v17, %v3505_v16  ;;  %v4439_v27 = vpack.c.bf16 %v3510_v26, %v3508_v25 }
 0x1bc   :  { %4420 = vmatpush1.bf16.msra.mxu0 %v4419_v28  ;;  %v3513_v28 = vld [vmem:[%s6070_s4 + $0x1a8] sm:$0xff] }
 0x1bd   :  { %4422 = vmatprep.subr.bf16.mxu0 %v4421_v29  ;;  %v4284_v50 = vpop.f32.mrb[24].mxu0  ;;  %v3515_v29 = vld [vmem:[%s6070_s4 + $0x1b8] sm:$0xff] }
 0x1be   :  { %v4285_v46 = vpop.f32.mrb[25].mxu0  ;;  %v4441_v30 = vpack.c.bf16 %v3515_v29, %v3513_v28 }
 0x1bf   :  { %v4286_v53 = vadd.f32 %v4285_v46, %v4284_v50  ;;  %v4287_v54 = vpop.f32.mrb[26].mxu0  ;;  %v6047_v50 = vld [vmem:[%s6071_s5] sm:$0xff] }
 0x1c0   :  { %4424 = vmatpush1.bf16.msra.mxu0 %v4423_v34  ;;  %v4288_v55 = vpop.f32.mrb[27].mxu0  ;;  %v3517_v34 = vld [vmem:[%s6070_s4 + $0x1c8] sm:$0xff] }
 0x1c1   :  { %4426 = vmatprep.subr.bf16.mxu0 %v4425_v35  ;;  %v3519_v35 = vld [vmem:[%s6070_s4 + $0x1d8] sm:$0xff] }
 0x1c2   :  { %v4445_v36 = vpack.c.bf16 %v3519_v35, %v3517_v34 }
 0x1c4   :  { %4428 = vmatpush1.bf16.msra.mxu0 %v4427_v40  ;;  %v3521_v40 = vld [vmem:[%s6070_s4 + $0x1e8] sm:$0xff] }
 0x1c5   :  { %4430 = vmatprep.subr.bf16.mxu0 %v4429_v41  ;;  %v3523_v41 = vld [vmem:[%s6070_s4 + $0x1f8] sm:$0xff] }
 0x1c6   :  { %v4449_v42 = vpack.c.bf16 %v3523_v41, %v3521_v40 }
 0x1c8   :  { %4432 = vmatpush1.bf16.msra.mxu0 %v4431_v44  ;;  %v3522_v44 = vld [vmem:[%s6070_s4 + $0x1f0] sm:$0xff] }
 0x1c9   :  { %4434 = vmatprep.subr.bf16.mxu0 %v4433_v18 }
 0x1cc   :  { %4436 = vmatpush1.bf16.msra.mxu0 %v4435_v21 }
 0x1d5   :  { %v4262_v45 = vpop.f32.mrb[28].mxu1 }
 0x1d6   :  { %v4263_v47 = vpop.f32.mrb[29].mxu1 }
 0x1d7   :  { %v4264_v48 = vadd.f32 %v4263_v47, %v4262_v45  ;;  %v4265_v49 = vpop.f32.mrb[30].mxu1  ;;  %v4451_v45 = vpack.c.bf16 %v3522_v44, %v3520_v43  ;;  %v3367_v47 = vlaneseq }
 0x1d8   :  { %v4266_v51 = vpop.f32.mrb[31].mxu1 }
 0x1d9   :  { %v3142_v52 = vadd.f32 %v4264_v48, %v3102_v23  ;;  %v3509_v23 = vld [vmem:[%s6070_s4 + $0x188] sm:$0xff]  ;;  %v6041_v48 = vshrl.u32 %v3367_v47, 7 }
 0x1da   :  { %v4437_v22 = vpack.c.bf16 %v3511_v24, %v3509_v23  ;;  %v3348_v51 = vld [vmem:[%s6071_s5 + $0x8] sm:$0xff] }
 0x1db   :  { %v3182_v56 = vadd.f32 %v4286_v53, %v3142_v52  ;;  %v3369_v49 = vsub.s32 0, %v6041_v48  ;;  %v3624_v24 = vsub.s32 2, %v6041_v48 }
 0x1dc   :  { %4438 = vmatprep.subr.bf16.mxu0 %v4437_v22  ;;  %v3634_v22 = vsub.s32 3, %v6041_v48 }
 0x1dd   :  { %4440 = vmatpush1.bf16.msra.mxu0 %v4439_v27  ;;  %v3370_v52 = vrot.slane %v6047_v50, %v3369_v49  ;;  %v3374_v46 = vrot.slane %v3348_v51, %v3369_v49  ;;  %v3625_v25 = vrot.slane %v6047_v50, %v3624_v24  ;;  %v3629_v26 = vrot.slane %v3348_v51, %v3624_v24 }
 0x1de   :  { %4442 = vmatprep.subr.bf16.mxu0 %v4441_v30  ;;  %v3644_v27 = vsub.s32 4, %v6041_v48  ;;  %v3635_v31 = vrot.slane %v6047_v50, %v3634_v22  ;;  %v3639_v32 = vrot.slane %v3348_v51, %v3634_v22 }
 0x1e0   :  { %v3645_v35 = vrot.slane %v6047_v50, %v3644_v27 }
 0x1e1   :  { %4444 = vmatpush1.bf16.msra.mxu0 %v4443_v33 }
 0x1e2   :  { %4446 = vmatprep.subr.bf16.mxu0 %v4445_v36  ;;  %v3649_v36 = vrot.slane %v3348_v51, %v3644_v27 }
 0x1e5   :  { %4448 = vmatpush1.bf16.msra.mxu0 %v4447_v39 }
 0x1e6   :  { %4450 = vmatprep.subr.bf16.mxu0 %v4449_v42  ;;  %v3657_v42 = vsub.s32 5, %v6041_v48 }
 0x1e8   :  { %v3658_v43 = vrot.slane %v6047_v50, %v3657_v42 }
 0x1e9   :  { %4452 = vmatpush1.bf16.msra.mxu0 %v4451_v45 }
 0x1f5   :  { %v4306_v57 = vpop.f32.mrb[32].mxu1 }
 0x1f6   :  { %v4307_v58 = vpop.f32.mrb[33].mxu1 }
 0x1f7   :  { %v4308_v59 = vadd.f32 %v4307_v58, %v4306_v57  ;;  %v4309_v60 = vpop.f32.mrb[34].mxu1 }
 0x1f8   :  { %v4328_v61 = vpop.f32.mrb[28].mxu0  ;;  %v4310_v62 = vpop.f32.mrb[35].mxu1 }
 0x1f9   :  { %v3222_v63 = vadd.f32 %v4308_v59, %v3182_v56  ;;  %v4329_v0 = vpop.f32.mrb[29].mxu0 }
 0x1fa   :  { %v4330_v1 = vadd.f32 %v4329_v0, %v4328_v61  ;;  %v4331_v2 = vpop.f32.mrb[30].mxu0 }
 0x1fb   :  { %v4332_v4 = vpop.f32.mrb[31].mxu0 }
 0x1fc   :  { %v3262_v5 = vadd.f32 %v4330_v1, %v3222_v63  ;;  %v3526_v4 = vsub.s32 1, %v6041_v48 }
 0x215   :  { %v3341_v6 = vpop.f32.mrb[32].mxu0  ;;  %v4350_v10 = vpop.f32.mrb[36].mxu1 }
 0x216   :  { %v4371_v7 = vpop.f32.mrb[33].mxu0  ;;  %v4351_v11 = vpop.f32.mrb[37].mxu1 }
 0x217   :  { %v3344_v8 = vpop.f32.mrb[34].mxu0  ;;  %v4352_v13 = vadd.f32 %v4351_v11, %v4350_v10  ;;  %v4353_v3 = vpop.f32.mrb[38].mxu1 }
 0x218   :  { %v4372_v9 = vpop.f32.mrb[35].mxu0  ;;  %v4354_v12 = vpop.f32.mrb[39].mxu1 }
 0x219   :  { %v3302_v14 = vadd.f32 %v4352_v13, %v3262_v5  ;;  %v3527_v5 = vrot.slane %v6047_v50, %v3526_v4 }
 0x21b   :  { %v3342_v15 = vadd.f32 %v3341_v6, %v3302_v14  ;;  %v3531_v6 = vrot.slane %v3348_v51, %v3526_v4 }
 0x21d   :  { %3959 = vmatmul.mubr.msk.f32.vlgmr.msra.gmra.mrb[40].mxu1 %vm3375_vm2, %v3342_v15 }
 0x2f0   :  { %v3445_v53 = vpop.f32.mrb[40].mxu1 }
 0x2f1   :  { %v3446_v54 = vadd.f32 %v3445_v53, %v3370_v52  ;;  %v3447_v55 = vpop.f32.mrb[41].mxu1 }
 0x2f2   :  { %v3448_v56 = vadd.f32 %v3447_v55, %v3374_v46 }
 0x2f3   :  { %v3452_v57 = vmul.f32 0.70710677, %v3446_v54  ;;  %v3450_v0 = vmul.f32 0.5, %v3446_v54 }
 0x2f4   :  { %v3453_v58 = vmul.f32 0.70710677, %v3448_v56  ;;  %v3451_v62 = vmul.f32 0.5, %v3448_v56 }
 0x2f5   :  { %4747 = verf.f32 %v3452_v57 }
 0x2f6   :  { %4749 = verf.f32 %v3453_v58 }
 0x2ff   :  { %v4748_v59 = vpop.eup %4747 }
 0x300   :  { %v4750_v60 = vpop.eup %4749  ;;  %v3456_v61 = vadd.f32 1.0, %v4748_v59 }
 0x301   :  { %v3457_v63 = vadd.f32 1.0, %v4750_v60 }
 0x302   :  { %v3458_v2 = vmul.f32 %v3456_v61, %v3450_v0 }
 0x303   :  { %v3459_v1 = vmul.f32 %v3457_v63, %v3451_v62 }
 0x305   :  { %3596 = vmatprep.mubr.f32.mxu0 %v3459_v1 }
 0x306   :  { %3597 = vmatmul.mubr.f32.vlgmr.msra.gmra.mrb[36].mxu0 %v3458_v2 }
 0x3d9   :  { %v3598_v7 = vpop.f32.mrb[36].mxu0 }
 0x3da   :  { %v3599_v8 = vadd.f32 %v3598_v7, %v3527_v5  ;;  %v3600_v9 = vpop.f32.mrb[37].mxu0 }
 0x3db   :  { %v3601_v10 = vadd.f32 %v3600_v9, %v3531_v6 }
 0x3dc   :  { %v3603_v11 = vadd.f32 %v3599_v8, %v3446_v54 }
 0x3dd   :  { %v3604_v13 = vadd.f32 %v3601_v10, %v3448_v56 }
 0x3df   :  { %v3605_v3 = vadd.f32 %v3604_v13, %v3603_v11 }
 0x3e1   :  { %3606 = vadd.xlane.f32.xlu0 %v3605_v3 }
 0x46e   :  { %v3607_v12 = vpop.xlane.xlu0 %3606 }
 0x46f   :  { %v3609_v14 = vmul.f32 0.00390625, %v3607_v12 }
 0x471   :  { %v3610_v15 = vsub.f32 %v3603_v11, %v3609_v14  ;;  %v3611_v16 = vsub.f32 %v3604_v13, %v3609_v14 }
 0x473   :  { %v3612_v17 = vmul.f32 %v3610_v15, %v3610_v15  ;;  %v3613_v18 = vmul.f32 %v3611_v16, %v3611_v16 }
 0x475   :  { %v3614_v19 = vadd.f32 %v3613_v18, %v3612_v17 }
 0x477   :  { %3615 = vadd.xlane.f32.xlu0 %v3614_v19 }
 0x504   :  { %v3616_v20 = vpop.xlane.xlu0 %3615 }
 0x505   :  { %v3617_v21 = vmul.f32 0.00390625, %v3616_v20 }
 0x507   :  { %v3618_v23 = vadd.f32 1e-05, %v3617_v21 }
 0x509   :  { %4751 = vrsqrt.f32 %v3618_v23 }
 0x513   :  { %v4752_v28 = vpop.eup %4751 }
 0x514   :  { %v3620_v29 = vmul.f32 %v4752_v28, %v3610_v15  ;;  %v3621_v30 = vmul.f32 %v4752_v28, %v3611_v16 }
 0x516   :  { %v3630_v33 = vmul.f32 %v3625_v25, %v3620_v29  ;;  %v3631_v34 = vmul.f32 %v3629_v26, %v3621_v30 }
 0x518   :  { %v3640_v37 = vadd.f32 %v3635_v31, %v3630_v33  ;;  %v3641_v38 = vadd.f32 %v3639_v32, %v3631_v34 }
 0x51a   :  { %v3650_v39 = vmul.f32 %v3645_v35, %v3640_v37  ;;  %v3651_v40 = vmul.f32 %v3649_v36, %v3641_v38 }
 0x51c   :  { %v3652_v41 = vadd.f32 %v3651_v40, %v3650_v39 }
 0x51e   :  { %3653 = vadd.xlane.f32.xlu1 %v3652_v41 }
 0x5ab   :  { %v3654_v44 = vpop.xlane.xlu1 %3653 }
 0x5ac   :  { %v3659_v45 = vadd.f32 %v3658_v43, %v3654_v44 }
 0x5ae   :  { %3661 = vst.msk [vmem:[%s6072_s6] sm:$0xff] %vm3660_vm3, %v3659_v45 }

</bundles_post_ra>
